<compile_context>
chip_gen: v7x
topology: tpu7x:2x2x1
jax: 0.10.0
libtpu: 0.0.40
codegen_flags: <defaults>
</compile_context>

<pallas_src>
import functools

import jax
import jax.numpy as jnp
from jax.experimental import pallas as pl
from jax.experimental.pallas import tpu as pltpu

EPS = 1e-5          # torch nn.LayerNorm default
NEG_INF = -1e30     # finite mask value (robust vs -inf + max-subtraction)

_PARAMS = pltpu.CompilerParams(
    dimension_semantics=("parallel",),
    vmem_limit_bytes=56 * 1024 * 1024,   # explicit limit; fits v7x's 64 MiB
)


# ----------------------------- in-kernel helpers -----------------------------

def _layernorm(x, gamma, beta):
    """LayerNorm over the last dim; x: (N, D) f32, gamma/beta: (1, D) f32."""
    mu = jnp.mean(x, axis=-1, keepdims=True)
    var = jnp.mean((x - mu) ** 2, axis=-1, keepdims=True)
    return (x - mu) * jax.lax.rsqrt(var + EPS) * gamma + beta


def _bf16(x):
    return x.astype(jnp.bfloat16)


def _mha(q_in, kv_in, wqkv_t, bqkv, wo_t, bo, *, num_heads, bt, lq, lk, self_attn):
    """nn.MultiheadAttention (eval mode) with the strict upper-triangular ut_mask.

    q_in:  (bt*lq, D) f32 rows;  kv_in: (bt*lk, D) f32 rows.
    wqkv_t: (D, 3D) bf16 (pre-transposed in_proj_weight); bqkv: (1, 3D) f32.
    wo_t:   (D, D)  bf16 (pre-transposed out_proj.weight); bo:   (1, D)  f32.
    Returns the out-projected attention, (bt*lq, D) f32.
    """
    d = wo_t.shape[0]
    hd = d // num_heads
    scale = 1.0 / (hd ** 0.5)

    if self_attn:
        # One packed (rows, D) @ (D, 3D) MXU matmul for Q, K and V together.
        qkv = jnp.dot(_bf16(q_in), wqkv_t, preferred_element_type=jnp.float32) + bqkv
        qp, kp, vp = qkv[:, :d], qkv[:, d:2 * d], qkv[:, 2 * d:]
    else:
        qp = jnp.dot(_bf16(q_in), wqkv_t[:, :d],
                     preferred_element_type=jnp.float32) + bqkv[:, :d]
        kv = jnp.dot(_bf16(kv_in), wqkv_t[:, d:],
                     preferred_element_type=jnp.float32) + bqkv[:, d:]
        kp, vp = kv[:, :d], kv[:, d:]

    qp = qp.reshape(bt, lq, d)
    kp = kp.reshape(bt, lk, d)
    vp = vp.reshape(bt, lk, d)

    # ut_mask: strict upper triangle disallowed (additive, finite).
    row = jax.lax.broadcasted_iota(jnp.int32, (lq, lk), 0)
    col = jax.lax.broadcasted_iota(jnp.int32, (lq, lk), 1)
    addmask = jnp.where(col > row, jnp.float32(NEG_INF), jnp.float32(0.0))[None]

    heads = []
    for h in range(num_heads):                  # static loop, num_heads is small
        sl = slice(h * hd, (h + 1) * hd)
        qh = qp[:, :, sl] * scale               # (bt, lq, hd) f32
        kh = kp[:, :, sl]
        vh = vp[:, :, sl]
        s = jnp.einsum("bqd,bkd->bqk", _bf16(qh), _bf16(kh),
                       preferred_element_type=jnp.float32) + addmask
        s = s - jnp.max(s, axis=-1, keepdims=True)
        p = jnp.exp(s)
        p = p * pl.reciprocal(jnp.sum(p, axis=-1, keepdims=True), approx=True)
        heads.append(jnp.einsum("bqk,bkd->bqd", _bf16(p), _bf16(vh),
                                preferred_element_type=jnp.float32))

    # Concat heads along lanes, then ONE full-width K=D output projection
    # (instead of H narrow K=hd matmuls) -> full MXU row utilization.
    attn = jnp.concatenate(heads, axis=-1) if num_heads > 1 else heads[0]
    return jnp.dot(_bf16(attn.reshape(bt * lq, d)), wo_t,
                   preferred_element_type=jnp.float32) + bo


def _ffn(x, w1_t, b1, w2_t, b2):
    """transformer_FFN: Linear -> ReLU -> (dropout = id) -> Linear.  x: (N, D)."""
    h = jnp.dot(_bf16(x), w1_t, preferred_element_type=jnp.float32) + b1
    h = jnp.maximum(h, 0.0)
    return jnp.dot(_bf16(h), w2_t, preferred_element_type=jnp.float32) + b2


# ----------------------------- fused block kernels -----------------------------

def _encoder_kernel(x_ref, g1_ref, b1_ref, wqkv_ref, bqkv_ref, wo_ref, bo_ref,
                    g2_ref, b2_ref, w1_ref, fb1_ref, w2_ref, fb2_ref, o_ref,
                    *, num_heads):
    bt, l, d = x_ref.shape
    x = x_ref[...].astype(jnp.float32).reshape(bt * l, d)     # bf16 in -> f32 math
    x1 = _layernorm(x, g1_ref[...], b1_ref[...])
    attn = _mha(x1, x1, wqkv_ref[...], bqkv_ref[...], wo_ref[...], bo_ref[...],
                num_heads=num_heads, bt=bt, lq=l, lk=l, self_attn=True)
    out = x1 + attn                      # skip connection uses the LN'd value (pykt)
    x2 = _layernorm(out, g2_ref[...], b2_ref[...])
    f = _ffn(x2, w1_ref[...], fb1_ref[...], w2_ref[...], fb2_ref[...])
    o_ref[...] = (f + x2).reshape(bt, l, d).astype(o_ref.dtype)   # bf16 store


def _decoder_kernel(y_ref, en_ref,
                    g1_ref, b1_ref, a1w_ref, a1b_ref, a1wo_ref, a1bo_ref,
                    g2_ref, b2_ref, a2w_ref, a2b_ref, a2wo_ref, a2bo_ref,
                    g3_ref, b3_ref, w1_ref, fb1_ref, w2_ref, fb2_ref,
                    o_ref, *, num_heads):
    bt, l, d = y_ref.shape
    y = y_ref[...].astype(jnp.float32).reshape(bt * l, d)
    x1 = _layernorm(y, g1_ref[...], b1_ref[...])
    attn1 = _mha(x1, x1, a1w_ref[...], a1b_ref[...], a1wo_ref[...], a1bo_ref[...],
                 num_heads=num_heads, bt=bt, lq=l, lk=l, self_attn=True)
    out = x1 + attn1
    en = en_ref[...].astype(jnp.float32).reshape(bt * l, d)
    en_n = _layernorm(en, g2_ref[...], b2_ref[...])       # LN2 on encoder output
    attn2 = _mha(out, en_n, a2w_ref[...], a2b_ref[...], a2wo_ref[...], a2bo_ref[...],
                 num_heads=num_heads, bt=bt, lq=l, lk=l, self_attn=False)
    out = out + attn2
    x3 = _layernorm(out, g3_ref[...], b3_ref[...])
    f = _ffn(x3, w1_ref[...], fb1_ref[...], w2_ref[...], fb2_ref[...])
    o_ref[...] = (f + x3).reshape(bt, l, d).astype(o_ref.dtype)   # bf16 store


# ----------------------------- pallas_call wrappers -----------------------------

def _tile_spec(bt, l, d):
    return pl.BlockSpec((bt, l, d), lambda b: (b, 0, 0))


def _full_spec(arr):
    """Whole-array spec for grid-invariant weights; single-buffered when the
    installed Pallas supports pipeline_mode (the block index never changes,
    so the second pipeline buffer would be dead VMEM)."""
    nd = arr.ndim
    idx = lambda b, _nd=nd: (0,) * _nd
    try:
        return pl.BlockSpec(arr.shape, idx, pipeline_mode=pl.Buffered(1))
    except (AttributeError, TypeError):
        return pl.BlockSpec(arr.shape, idx)


def _batch_tile(batch, seq_len, target_rows=512):
    """Largest divisor of `batch` giving ~`target_rows` rows per grid step,
    while keeping at least 2 grid steps (v7x megacore) when batch allows."""
    bt = max(1, min(batch, target_rows // max(seq_len, 1)))
    if batch >= 2:
        bt = min(bt, max(1, batch // 2))
    while batch % bt:
        bt -= 1
    return bt


def encoder_block_apply(p, x, *, num_heads, bt):
    B, L, D = x.shape
    kernel = functools.partial(_encoder_kernel, num_heads=num_heads)
    args = (x,
            p["ln1_g"], p["ln1_b"],
            p["attn_wqkv_t"], p["attn_bqkv"], p["attn_wo_t"], p["attn_bo"],
            p["ln2_g"], p["ln2_b"],
            p["ffn_w1_t"], p["ffn_b1"], p["ffn_w2_t"], p["ffn_b2"])
    return pl.pallas_call(
        kernel,
        out_shape=jax.ShapeDtypeStruct((B, L, D), jnp.bfloat16),
        grid=(B // bt,),
        in_specs=[_tile_spec(bt, L, D)] + [_full_spec(a) for a in args[1:]],
        out_specs=_tile_spec(bt, L, D),
        compiler_params=_PARAMS,
    )(*args)


def decoder_block_apply(p, y, en_out, *, num_heads, bt):
    B, L, D = y.shape
    kernel = functools.partial(_decoder_kernel, num_heads=num_heads)
    args = (y, en_out,
            p["ln1_g"], p["ln1_b"],
            p["attn1_wqkv_t"], p["attn1_bqkv"], p["attn1_wo_t"], p["attn1_bo"],
            p["ln2_g"], p["ln2_b"],
            p["attn2_wqkv_t"], p["attn2_bqkv"], p["attn2_wo_t"], p["attn2_bo"],
            p["ln3_g"], p["ln3_b"],
            p["ffn_w1_t"], p["ffn_b1"], p["ffn_w2_t"], p["ffn_b2"])
    return pl.pallas_call(
        kernel,
        out_shape=jax.ShapeDtypeStruct((B, L, D), jnp.bfloat16),
        grid=(B // bt,),
        in_specs=([_tile_spec(bt, L, D), _tile_spec(bt, L, D)]
                  + [_full_spec(a) for a in args[2:]]),
        out_specs=_tile_spec(bt, L, D),
        compiler_params=_PARAMS,
    )(*args)


# ----------------------------- SAINT forward -----------------------------

def saint_forward(params, diff, in_ex, in_cat, in_res, *, num_heads, n_blocks):
    del diff                                  # unused for emb_type='qid'
    B, L = in_ex.shape
    bt = _batch_tile(B, L)
    in_pos = params["embd_pos"][None, :L]     # pos_encode + embd_pos -> [1, L, D]

    # ---- encoder stack (bf16 activations between blocks) ----
    x = None
    for i in range(n_blocks):
        p = params["encoder"][i]
        if i == 0:
            h = (jnp.take(p["interaction_emb"], in_ex, axis=0)
                 + jnp.take(p["emb_cat"], in_cat, axis=0) + in_pos)
            h = h.astype(jnp.bfloat16)
        else:
            h = x
        x = encoder_block_apply(p, h, num_heads=num_heads, bt=bt)

    # ---- decoder stack ----
    start = jnp.full((B, 1), 2, dtype=in_res.dtype)       # start token id = 2
    res_ids = jnp.concatenate([start, in_res], axis=-1)   # [B, L] ids
    y = None
    for i in range(n_blocks):
        p = params["decoder"][i]
        if i == 0:
            h = (jnp.take(p["embd_res"], res_ids, axis=0) + in_pos).astype(jnp.bfloat16)
        else:
            h = y
        y = decoder_block_apply(p, h, x, num_heads=num_heads, bt=bt)

    # ---- output head: Linear(D, 1) + sigmoid + squeeze(-1), lane-dense in XLA ----
    logits = jnp.dot(y.astype(jnp.float32), params["out_w"][0]) + params["out_b"][0]
    return jax.nn.sigmoid(logits)             # [B, L]


# ----------------------------- deterministic params -----------------------------

def init_saint_params(key, num_q, num_c, total_res, seq_len, emb_size, n_blocks):
    """Deterministic parameters in the torch layout ([out_features, in_features])."""
    keys = iter(jax.random.split(key, 512))

    def nrm(shape, scale=0.05):
        return jax.random.normal(next(keys), shape, jnp.float32) * scale

    def ln():
        return (jnp.ones((1, emb_size), jnp.float32),
                jnp.zeros((1, emb_size), jnp.float32))

    def attn(prefix):
        return {
            f"{prefix}_wqkv": nrm((3 * emb_size, emb_size)),   # in_proj_weight
            f"{prefix}_bqkv": jnp.zeros((1, 3 * emb_size), jnp.float32),
            f"{prefix}_wo": nrm((emb_size, emb_size)),         # out_proj.weight
            f"{prefix}_bo": jnp.zeros((1, emb_size), jnp.float32),
        }

    def ffn():
        return {
            "ffn_w1": nrm((emb_size, emb_size)),
            "ffn_b1": jnp.zeros((1, emb_size), jnp.float32),
            "ffn_w2": nrm((emb_size, emb_size)),
            "ffn_b2": jnp.zeros((1, emb_size), jnp.float32),
        }

    def enc_block():
        g1, b1 = ln(); g2, b2 = ln()
        p = {"interaction_emb": nrm((num_q, emb_size)),
             "emb_cat": nrm((num_c, emb_size)),
             "ln1_g": g1, "ln1_b": b1, "ln2_g": g2, "ln2_b": b2}
        p.update(attn("attn")); p.update(ffn())
        return p

    def dec_block():
        g1, b1 = ln(); g2, b2 = ln(); g3, b3 = ln()
        p = {"embd_res": nrm((total_res + 1, emb_size)),
             "ln1_g": g1, "ln1_b": b1, "ln2_g": g2, "ln2_b": b2,
             "ln3_g": g3, "ln3_b": b3}
        p.update(attn("attn1")); p.update(attn("attn2")); p.update(ffn())
        return p

    return {
        "embd_pos": nrm((seq_len, emb_size)),
        "encoder": [enc_block() for _ in range(n_blocks)],
        "decoder": [dec_block() for _ in range(n_blocks)],
        "out_w": nrm((1, emb_size)),
        "out_b": jnp.zeros((1,), jnp.float32),
    }


def prepare_params(params):
    """One-time host-side prep: pre-transpose matmul weights to [in, out] and
    cast them to bf16 (accumulation stays f32 inside the kernels); LayerNorm
    affine, biases and embedding tables stay f32."""
    def wt(w):
        return jnp.asarray(w.T, jnp.bfloat16)

    def prep_attn(p, prefix):
        return {
            f"{prefix}_wqkv_t": wt(p[f"{prefix}_wqkv"]),   # [D, 3D] bf16
            f"{prefix}_bqkv": p[f"{prefix}_bqkv"],
            f"{prefix}_wo_t": wt(p[f"{prefix}_wo"]),       # [D, D] bf16
            f"{prefix}_bo": p[f"{prefix}_bo"],
        }

    def prep_common(p):
        out = {k: v for k, v in p.items()
               if k.startswith("ln") or k in ("interaction_emb", "emb_cat", "embd_res")}
        out.update({"ffn_w1_t": wt(p["ffn_w1"]), "ffn_b1": p["ffn_b1"],
                    "ffn_w2_t": wt(p["ffn_w2"]), "ffn_b2": p["ffn_b2"]})
        return out

    enc = []
    for p in params["encoder"]:
        q = prep_common(p); q.update(prep_attn(p, "attn")); enc.append(q)
    dec = []
    for p in params["decoder"]:
        q = prep_common(p); q.update(prep_attn(p, "attn1")); q.update(prep_attn(p, "attn2"))
        dec.append(q)
    return {"embd_pos": params["embd_pos"], "encoder": enc, "decoder": dec,
            "out_w": params["out_w"], "out_b": params["out_b"]}


# ----------------------------- demo -----------------------------

if __name__ == "__main__":
    B, L, D, H = 2, 8, 32, 2          # batch, seq_len, emb_size, num_attn_heads
    num_q, num_c, n_blocks = 10, 5, 1
    total_res = 2                      # decoder Embedding(total_res + 1, emb_size)

    key = jax.random.PRNGKey(0)
    k_ex, k_cat, k_res, k_par = jax.random.split(key, 4)
    in_ex = jax.random.randint(k_ex, (B, L), 0, num_q, dtype=jnp.int32)
    in_cat = jax.random.randint(k_cat, (B, L), 0, num_c, dtype=jnp.int32)
    # responses are shifted by one; start token '2' is prepended in the forward
    in_res = jax.random.randint(k_res, (B, L - 1), 0, 2, dtype=jnp.int32)
    diff = jnp.zeros((B, L - 1), jnp.int32)   # unused for emb_type='qid'

    params = prepare_params(
        init_saint_params(k_par, num_q, num_c, total_res, L, D, n_blocks))

    fwd = jax.jit(functools.partial(saint_forward, num_heads=H, n_blocks=n_blocks))
    out = fwd(params, diff, in_ex, in_cat, in_res)
    jax.block_until_ready(out)
    assert out.shape == (B, L)
    assert bool(jnp.all(jnp.isfinite(out)))
    print("KERNEL_OK")
</pallas_src>

<mosaic_0001>
module attributes {stable_mosaic.version = 11 : i64} {
  func.func @_encoder_kernel(%arg0: i32, %arg1: memref<1x8x32xbf16, #tpu.memory_space<vmem>>, %arg2: memref<1x32xf32, #tpu.memory_space<vmem>>, %arg3: memref<1x32xf32, #tpu.memory_space<vmem>>, %arg4: memref<32x96xbf16, #tpu.memory_space<vmem>>, %arg5: memref<1x96xf32, #tpu.memory_space<vmem>>, %arg6: memref<32x32xbf16, #tpu.memory_space<vmem>>, %arg7: memref<1x32xf32, #tpu.memory_space<vmem>>, %arg8: memref<1x32xf32, #tpu.memory_space<vmem>>, %arg9: memref<1x32xf32, #tpu.memory_space<vmem>>, %arg10: memref<32x32xbf16, #tpu.memory_space<vmem>>, %arg11: memref<1x32xf32, #tpu.memory_space<vmem>>, %arg12: memref<32x32xbf16, #tpu.memory_space<vmem>>, %arg13: memref<1x32xf32, #tpu.memory_space<vmem>>, %arg14: memref<1x8x32xbf16, #tpu.memory_space<vmem>>) attributes {dimension_semantics = [#tpu.dimension_semantics<parallel>], iteration_bounds = array<i64: 2>, scalar_prefetch = 0 : i64, scratch_operands = 0 : i64, tpu.core_type = #tpu.core_type<tc>, window_params = [{transform_indices = @transform_0, window_bounds = array<i64: 1, 8, 32>}, {pipeline_mode = #tpu.pipeline_mode<synchronous>, transform_indices = @transform_1, window_bounds = array<i64: 1, 32>}, {pipeline_mode = #tpu.pipeline_mode<synchronous>, transform_indices = @transform_2, window_bounds = array<i64: 1, 32>}, {pipeline_mode = #tpu.pipeline_mode<synchronous>, transform_indices = @transform_3, window_bounds = array<i64: 32, 96>}, {pipeline_mode = #tpu.pipeline_mode<synchronous>, transform_indices = @transform_4, window_bounds = array<i64: 1, 96>}, {pipeline_mode = #tpu.pipeline_mode<synchronous>, transform_indices = @transform_5, window_bounds = array<i64: 32, 32>}, {pipeline_mode = #tpu.pipeline_mode<synchronous>, transform_indices = @transform_6, window_bounds = array<i64: 1, 32>}, {pipeline_mode = #tpu.pipeline_mode<synchronous>, transform_indices = @transform_7, window_bounds = array<i64: 1, 32>}, {pipeline_mode = #tpu.pipeline_mode<synchronous>, transform_indices = @transform_8, window_bounds = array<i64: 1, 32>}, {pipeline_mode = #tpu.pipeline_mode<synchronous>, transform_indices = @transform_9, window_bounds = array<i64: 32, 32>}, {pipeline_mode = #tpu.pipeline_mode<synchronous>, transform_indices = @transform_10, window_bounds = array<i64: 1, 32>}, {pipeline_mode = #tpu.pipeline_mode<synchronous>, transform_indices = @transform_11, window_bounds = array<i64: 32, 32>}, {pipeline_mode = #tpu.pipeline_mode<synchronous>, transform_indices = @transform_12, window_bounds = array<i64: 1, 32>}, {transform_indices = @transform_13, window_bounds = array<i64: 1, 8, 32>}]} {
    %c0 = arith.constant 0 : index
    %c0_0 = arith.constant 0 : index
    %c0_1 = arith.constant 0 : index
    %0 = vector.load %arg1[%c0, %c0_0, %c0_1] : memref<1x8x32xbf16, #tpu.memory_space<vmem>>, vector<1x8x32xbf16>
    %1 = arith.extf %0 : vector<1x8x32xbf16> to vector<1x8x32xf32>
    %2 = vector.shape_cast %1 : vector<1x8x32xf32> to vector<8x32xf32>
    %c0_2 = arith.constant 0 : index
    %c0_3 = arith.constant 0 : index
    %3 = vector.load %arg2[%c0_2, %c0_3] : memref<1x32xf32, #tpu.memory_space<vmem>>, vector<1x32xf32>
    %c0_4 = arith.constant 0 : index
    %c0_5 = arith.constant 0 : index
    %4 = vector.load %arg3[%c0_4, %c0_5] : memref<1x32xf32, #tpu.memory_space<vmem>>, vector<1x32xf32>
    %cst = arith.constant dense<0.000000e+00> : vector<8xf32>
    %5 = vector.multi_reduction <add>, %2, %cst [1] : vector<8x32xf32> to vector<8xf32>
    %6 = vector.shape_cast %5 : vector<8xf32> to vector<8x1xf32>
    %cst_6 = arith.constant 3.200000e+01 : f32
    %7 = vector.broadcast %cst_6 : f32 to vector<8x1xf32>
    %8 = arith.divf %6, %7 : vector<8x1xf32>
    %9 = vector.broadcast %8 : vector<8x1xf32> to vector<8x32xf32>
    %10 = arith.subf %2, %9 : vector<8x32xf32>
    %11 = arith.mulf %10, %10 : vector<8x32xf32>
    %cst_7 = arith.constant dense<0.000000e+00> : vector<8xf32>
    %12 = vector.multi_reduction <add>, %11, %cst_7 [1] : vector<8x32xf32> to vector<8xf32>
    %13 = vector.shape_cast %12 : vector<8xf32> to vector<8x1xf32>
    %cst_8 = arith.constant 3.200000e+01 : f32
    %14 = vector.broadcast %cst_8 : f32 to vector<8x1xf32>
    %15 = arith.divf %13, %14 : vector<8x1xf32>
    %16 = vector.broadcast %8 : vector<8x1xf32> to vector<8x32xf32>
    %17 = arith.subf %2, %16 : vector<8x32xf32>
    %cst_9 = arith.constant 9.99999974E-6 : f32
    %18 = vector.broadcast %cst_9 : f32 to vector<8x1xf32>
    %19 = arith.addf %15, %18 : vector<8x1xf32>
    %20 = math.rsqrt %19 : vector<8x1xf32>
    %21 = vector.broadcast %20 : vector<8x1xf32> to vector<8x32xf32>
    %22 = arith.mulf %17, %21 : vector<8x32xf32>
    %23 = vector.broadcast %3 : vector<1x32xf32> to vector<8x32xf32>
    %24 = arith.mulf %22, %23 : vector<8x32xf32>
    %25 = vector.broadcast %4 : vector<1x32xf32> to vector<8x32xf32>
    %26 = arith.addf %24, %25 : vector<8x32xf32>
    %c0_10 = arith.constant 0 : index
    %c0_11 = arith.constant 0 : index
    %27 = vector.load %arg4[%c0_10, %c0_11] : memref<32x96xbf16, #tpu.memory_space<vmem>>, vector<32x96xbf16>
    %c0_12 = arith.constant 0 : index
    %c0_13 = arith.constant 0 : index
    %28 = vector.load %arg5[%c0_12, %c0_13] : memref<1x96xf32, #tpu.memory_space<vmem>>, vector<1x96xf32>
    %c0_14 = arith.constant 0 : index
    %c0_15 = arith.constant 0 : index
    %29 = vector.load %arg6[%c0_14, %c0_15] : memref<32x32xbf16, #tpu.memory_space<vmem>>, vector<32x32xbf16>
    %c0_16 = arith.constant 0 : index
    %c0_17 = arith.constant 0 : index
    %30 = vector.load %arg7[%c0_16, %c0_17] : memref<1x32xf32, #tpu.memory_space<vmem>>, vector<1x32xf32>
    %31 = arith.truncf %26 : vector<8x32xf32> to vector<8x32xbf16>
    %cst_18 = arith.constant dense<0.000000e+00> : vector<8x96xf32>
    %32 = tpu.matmul %31, %27, %cst_18 {dimension_numbers = #tpu.dot_dimension_numbers<[1], [0], [0], [1], [0, 0, 1, 1], [], []>} : vector<8x32xbf16>, vector<32x96xbf16>, vector<8x96xf32> -> vector<8x96xf32>
    %33 = vector.broadcast %28 : vector<1x96xf32> to vector<8x96xf32>
    %34 = arith.addf %32, %33 : vector<8x96xf32>
    %35 = vector.extract_strided_slice %34 {offsets = [0, 0], sizes = [8, 32], strides = [1, 1]} : vector<8x96xf32> to vector<8x32xf32>
    %36 = vector.extract_strided_slice %34 {offsets = [0, 32], sizes = [8, 32], strides = [1, 1]} : vector<8x96xf32> to vector<8x32xf32>
    %37 = vector.extract_strided_slice %34 {offsets = [0, 64], sizes = [8, 32], strides = [1, 1]} : vector<8x96xf32> to vector<8x32xf32>
    %38 = vector.shape_cast %35 : vector<8x32xf32> to vector<1x8x32xf32>
    %39 = vector.shape_cast %36 : vector<8x32xf32> to vector<1x8x32xf32>
    %40 = vector.shape_cast %37 : vector<8x32xf32> to vector<1x8x32xf32>
    %41 = tpu.iota {dimensions = array<i32: 0>} : vector<8x8xi32>
    %42 = tpu.iota {dimensions = array<i32: 1>} : vector<8x8xi32>
    %43 = arith.cmpi sgt, %42, %41 : vector<8x8xi32>
    %cst_19 = arith.constant -1.000000e+30 : f32
    %cst_20 = arith.constant 0.000000e+00 : f32
    %44 = vector.broadcast %cst_19 : f32 to vector<8x8xf32>
    %45 = vector.broadcast %cst_20 : f32 to vector<8x8xf32>
    %46 = arith.select %43, %44, %45 : vector<8x8xi1>, vector<8x8xf32>
    %47 = vector.shape_cast %46 : vector<8x8xf32> to vector<1x8x8xf32>
    %48 = vector.extract_strided_slice %38 {offsets = [0, 0, 0], sizes = [1, 8, 16], strides = [1, 1, 1]} : vector<1x8x32xf32> to vector<1x8x16xf32>
    %cst_21 = arith.constant 2.500000e-01 : f32
    %49 = vector.broadcast %cst_21 : f32 to vector<1x8x16xf32>
    %50 = arith.mulf %48, %49 : vector<1x8x16xf32>
    %51 = vector.extract_strided_slice %39 {offsets = [0, 0, 0], sizes = [1, 8, 16], strides = [1, 1, 1]} : vector<1x8x32xf32> to vector<1x8x16xf32>
    %52 = vector.extract_strided_slice %40 {offsets = [0, 0, 0], sizes = [1, 8, 16], strides = [1, 1, 1]} : vector<1x8x32xf32> to vector<1x8x16xf32>
    %53 = arith.truncf %50 : vector<1x8x16xf32> to vector<1x8x16xbf16>
    %54 = arith.truncf %51 : vector<1x8x16xf32> to vector<1x8x16xbf16>
    "tpu.trace_start"() <{level = 10 : i32, message = "bqd,bkd->bqk"}> : () -> ()
    %cst_22 = arith.constant dense<0.000000e+00> : vector<1x8x8xf32>
    %55 = tpu.matmul %53, %54, %cst_22 {dimension_numbers = #tpu.dot_dimension_numbers<[2], [2], [1], [1], [0, 0, 0, 1, 1, 1], [0], [0]>} : vector<1x8x16xbf16>, vector<1x8x16xbf16>, vector<1x8x8xf32> -> vector<1x8x8xf32>
    "tpu.trace_stop"() : () -> ()
    %56 = arith.addf %55, %47 : vector<1x8x8xf32>
    %cst_23 = arith.constant dense<0xFF800000> : vector<1x8xf32>
    %57 = vector.multi_reduction <maximumf>, %56, %cst_23 [2] : vector<1x8x8xf32> to vector<1x8xf32>
    %58 = vector.shape_cast %57 : vector<1x8xf32> to vector<1x8x1xf32>
    %59 = vector.broadcast %58 : vector<1x8x1xf32> to vector<1x8x8xf32>
    %60 = arith.subf %56, %59 : vector<1x8x8xf32>
    %61 = math.exp %60 : vector<1x8x8xf32>
    %cst_24 = arith.constant dense<0.000000e+00> : vector<1x8xf32>
    %62 = vector.multi_reduction <add>, %61, %cst_24 [2] : vector<1x8x8xf32> to vector<1x8xf32>
    %63 = vector.shape_cast %62 : vector<1x8xf32> to vector<1x8x1xf32>
    %64 = tpu.reciprocal %63 {approx = true} : vector<1x8x1xf32> -> vector<1x8x1xf32>
    %65 = vector.broadcast %64 : vector<1x8x1xf32> to vector<1x8x8xf32>
    %66 = arith.mulf %61, %65 : vector<1x8x8xf32>
    %67 = arith.truncf %66 : vector<1x8x8xf32> to vector<1x8x8xbf16>
    %68 = arith.truncf %52 : vector<1x8x16xf32> to vector<1x8x16xbf16>
    "tpu.trace_start"() <{level = 10 : i32, message = "bqk,bkd->bqd"}> : () -> ()
    %cst_25 = arith.constant dense<0.000000e+00> : vector<1x8x16xf32>
    %69 = tpu.matmul %67, %68, %cst_25 {dimension_numbers = #tpu.dot_dimension_numbers<[2], [1], [1], [2], [0, 0, 0, 1, 1, 2], [0], [0]>} : vector<1x8x8xbf16>, vector<1x8x16xbf16>, vector<1x8x16xf32> -> vector<1x8x16xf32>
    "tpu.trace_stop"() : () -> ()
    %70 = vector.extract_strided_slice %38 {offsets = [0, 0, 16], sizes = [1, 8, 16], strides = [1, 1, 1]} : vector<1x8x32xf32> to vector<1x8x16xf32>
    %cst_26 = arith.constant 2.500000e-01 : f32
    %71 = vector.broadcast %cst_26 : f32 to vector<1x8x16xf32>
    %72 = arith.mulf %70, %71 : vector<1x8x16xf32>
    %73 = vector.extract_strided_slice %39 {offsets = [0, 0, 16], sizes = [1, 8, 16], strides = [1, 1, 1]} : vector<1x8x32xf32> to vector<1x8x16xf32>
    %74 = vector.extract_strided_slice %40 {offsets = [0, 0, 16], sizes = [1, 8, 16], strides = [1, 1, 1]} : vector<1x8x32xf32> to vector<1x8x16xf32>
    %75 = arith.truncf %72 : vector<1x8x16xf32> to vector<1x8x16xbf16>
    %76 = arith.truncf %73 : vector<1x8x16xf32> to vector<1x8x16xbf16>
    "tpu.trace_start"() <{level = 10 : i32, message = "bqd,bkd->bqk"}> : () -> ()
    %cst_27 = arith.constant dense<0.000000e+00> : vector<1x8x8xf32>
    %77 = tpu.matmul %75, %76, %cst_27 {dimension_numbers = #tpu.dot_dimension_numbers<[2], [2], [1], [1], [0, 0, 0, 1, 1, 1], [0], [0]>} : vector<1x8x16xbf16>, vector<1x8x16xbf16>, vector<1x8x8xf32> -> vector<1x8x8xf32>
    "tpu.trace_stop"() : () -> ()
    %78 = arith.addf %77, %47 : vector<1x8x8xf32>
    %cst_28 = arith.constant dense<0xFF800000> : vector<1x8xf32>
    %79 = vector.multi_reduction <maximumf>, %78, %cst_28 [2] : vector<1x8x8xf32> to vector<1x8xf32>
    %80 = vector.shape_cast %79 : vector<1x8xf32> to vector<1x8x1xf32>
    %81 = vector.broadcast %80 : vector<1x8x1xf32> to vector<1x8x8xf32>
    %82 = arith.subf %78, %81 : vector<1x8x8xf32>
    %83 = math.exp %82 : vector<1x8x8xf32>
    %cst_29 = arith.constant dense<0.000000e+00> : vector<1x8xf32>
    %84 = vector.multi_reduction <add>, %83, %cst_29 [2] : vector<1x8x8xf32> to vector<1x8xf32>
    %85 = vector.shape_cast %84 : vector<1x8xf32> to vector<1x8x1xf32>
    %86 = tpu.reciprocal %85 {approx = true} : vector<1x8x1xf32> -> vector<1x8x1xf32>
    %87 = vector.broadcast %86 : vector<1x8x1xf32> to vector<1x8x8xf32>
    %88 = arith.mulf %83, %87 : vector<1x8x8xf32>
    %89 = arith.truncf %88 : vector<1x8x8xf32> to vector<1x8x8xbf16>
    %90 = arith.truncf %74 : vector<1x8x16xf32> to vector<1x8x16xbf16>
    "tpu.trace_start"() <{level = 10 : i32, message = "bqk,bkd->bqd"}> : () -> ()
    %cst_30 = arith.constant dense<0.000000e+00> : vector<1x8x16xf32>
    %91 = tpu.matmul %89, %90, %cst_30 {dimension_numbers = #tpu.dot_dimension_numbers<[2], [1], [1], [2], [0, 0, 0, 1, 1, 2], [0], [0]>} : vector<1x8x8xbf16>, vector<1x8x16xbf16>, vector<1x8x16xf32> -> vector<1x8x16xf32>
    "tpu.trace_stop"() : () -> ()
    %92 = tpu.concatenate %69, %91 in 2 : vector<1x8x16xf32>, vector<1x8x16xf32> -> vector<1x8x32xf32>
    %93 = vector.shape_cast %92 : vector<1x8x32xf32> to vector<8x32xf32>
    %94 = arith.truncf %93 : vector<8x32xf32> to vector<8x32xbf16>
    %cst_31 = arith.constant dense<0.000000e+00> : vector<8x32xf32>
    %95 = tpu.matmul %94, %29, %cst_31 {dimension_numbers = #tpu.dot_dimension_numbers<[1], [0], [0], [1], [0, 0, 1, 1], [], []>} : vector<8x32xbf16>, vector<32x32xbf16>, vector<8x32xf32> -> vector<8x32xf32>
    %96 = vector.broadcast %30 : vector<1x32xf32> to vector<8x32xf32>
    %97 = arith.addf %95, %96 : vector<8x32xf32>
    %98 = arith.addf %26, %97 : vector<8x32xf32>
    %c0_32 = arith.constant 0 : index
    %c0_33 = arith.constant 0 : index
    %99 = vector.load %arg8[%c0_32, %c0_33] : memref<1x32xf32, #tpu.memory_space<vmem>>, vector<1x32xf32>
    %c0_34 = arith.constant 0 : index
    %c0_35 = arith.constant 0 : index
    %100 = vector.load %arg9[%c0_34, %c0_35] : memref<1x32xf32, #tpu.memory_space<vmem>>, vector<1x32xf32>
    %cst_36 = arith.constant dense<0.000000e+00> : vector<8xf32>
    %101 = vector.multi_reduction <add>, %98, %cst_36 [1] : vector<8x32xf32> to vector<8xf32>
    %102 = vector.shape_cast %101 : vector<8xf32> to vector<8x1xf32>
    %cst_37 = arith.constant 3.200000e+01 : f32
    %103 = vector.broadcast %cst_37 : f32 to vector<8x1xf32>
    %104 = arith.divf %102, %103 : vector<8x1xf32>
    %105 = vector.broadcast %104 : vector<8x1xf32> to vector<8x32xf32>
    %106 = arith.subf %98, %105 : vector<8x32xf32>
    %107 = arith.mulf %106, %106 : vector<8x32xf32>
    %cst_38 = arith.constant dense<0.000000e+00> : vector<8xf32>
    %108 = vector.multi_reduction <add>, %107, %cst_38 [1] : vector<8x32xf32> to vector<8xf32>
    %109 = vector.shape_cast %108 : vector<8xf32> to vector<8x1xf32>
    %cst_39 = arith.constant 3.200000e+01 : f32
    %110 = vector.broadcast %cst_39 : f32 to vector<8x1xf32>
    %111 = arith.divf %109, %110 : vector<8x1xf32>
    %112 = vector.broadcast %104 : vector<8x1xf32> to vector<8x32xf32>
    %113 = arith.subf %98, %112 : vector<8x32xf32>
    %cst_40 = arith.constant 9.99999974E-6 : f32
    %114 = vector.broadcast %cst_40 : f32 to vector<8x1xf32>
    %115 = arith.addf %111, %114 : vector<8x1xf32>
    %116 = math.rsqrt %115 : vector<8x1xf32>
    %117 = vector.broadcast %116 : vector<8x1xf32> to vector<8x32xf32>
    %118 = arith.mulf %113, %117 : vector<8x32xf32>
    %119 = vector.broadcast %99 : vector<1x32xf32> to vector<8x32xf32>
    %120 = arith.mulf %118, %119 : vector<8x32xf32>
    %121 = vector.broadcast %100 : vector<1x32xf32> to vector<8x32xf32>
    %122 = arith.addf %120, %121 : vector<8x32xf32>
    %c0_41 = arith.constant 0 : index
    %c0_42 = arith.constant 0 : index
    %123 = vector.load %arg10[%c0_41, %c0_42] : memref<32x32xbf16, #tpu.memory_space<vmem>>, vector<32x32xbf16>
    %c0_43 = arith.constant 0 : index
    %c0_44 = arith.constant 0 : index
    %124 = vector.load %arg11[%c0_43, %c0_44] : memref<1x32xf32, #tpu.memory_space<vmem>>, vector<1x32xf32>
    %c0_45 = arith.constant 0 : index
    %c0_46 = arith.constant 0 : index
    %125 = vector.load %arg12[%c0_45, %c0_46] : memref<32x32xbf16, #tpu.memory_space<vmem>>, vector<32x32xbf16>
    %c0_47 = arith.constant 0 : index
    %c0_48 = arith.constant 0 : index
    %126 = vector.load %arg13[%c0_47, %c0_48] : memref<1x32xf32, #tpu.memory_space<vmem>>, vector<1x32xf32>
    %127 = arith.truncf %122 : vector<8x32xf32> to vector<8x32xbf16>
    %cst_49 = arith.constant dense<0.000000e+00> : vector<8x32xf32>
    %128 = tpu.matmul %127, %123, %cst_49 {dimension_numbers = #tpu.dot_dimension_numbers<[1], [0], [0], [1], [0, 0, 1, 1], [], []>} : vector<8x32xbf16>, vector<32x32xbf16>, vector<8x32xf32> -> vector<8x32xf32>
    %129 = vector.broadcast %124 : vector<1x32xf32> to vector<8x32xf32>
    %130 = arith.addf %128, %129 : vector<8x32xf32>
    %cst_50 = arith.constant 0.000000e+00 : f32
    %131 = vector.broadcast %cst_50 : f32 to vector<8x32xf32>
    %132 = arith.maximumf %130, %131 : vector<8x32xf32>
    %133 = arith.truncf %132 : vector<8x32xf32> to vector<8x32xbf16>
    %cst_51 = arith.constant dense<0.000000e+00> : vector<8x32xf32>
    %134 = tpu.matmul %133, %125, %cst_51 {dimension_numbers = #tpu.dot_dimension_numbers<[1], [0], [0], [1], [0, 0, 1, 1], [], []>} : vector<8x32xbf16>, vector<32x32xbf16>, vector<8x32xf32> -> vector<8x32xf32>
    %135 = vector.broadcast %126 : vector<1x32xf32> to vector<8x32xf32>
    %136 = arith.addf %134, %135 : vector<8x32xf32>
    %137 = arith.addf %136, %122 : vector<8x32xf32>
    %138 = vector.shape_cast %137 : vector<8x32xf32> to vector<1x8x32xf32>
    %139 = arith.truncf %138 : vector<1x8x32xf32> to vector<1x8x32xbf16>
    %c0_52 = arith.constant 0 : index
    %c0_53 = arith.constant 0 : index
    %c0_54 = arith.constant 0 : index
    %140 = vector.load %arg14[%c0_52, %c0_53, %c0_54] : memref<1x8x32xbf16, #tpu.memory_space<vmem>>, vector<1x8x32xbf16>
    tpu.vector_store %arg14[%c0_52, %c0_53, %c0_54], %139 {strides = array<i32>} : memref<1x8x32xbf16, #tpu.memory_space<vmem>>, vector<1x8x32xbf16>,
    return
  }
  func.func @transform_0(%arg0: i32) -> (i32, i32, i32) {
    %c0_i32 = arith.constant 0 : i32
    %c0_i32_0 = arith.constant 0 : i32
    %c0_i32_1 = arith.constant 0 : i32
    return %arg0, %c0_i32, %c0_i32_0 : i32, i32, i32
  }
  func.func @transform_1(%arg0: i32) -> (i32, i32) {
    %c0_i32 = arith.constant 0 : i32
    %c0_i32_0 = arith.constant 0 : i32
    %c0_i32_1 = arith.constant 0 : i32
    return %c0_i32, %c0_i32_0 : i32, i32
  }
  func.func @transform_2(%arg0: i32) -> (i32, i32) {
    %c0_i32 = arith.constant 0 : i32
    %c0_i32_0 = arith.constant 0 : i32
    %c0_i32_1 = arith.constant 0 : i32
    return %c0_i32, %c0_i32_0 : i32, i32
  }
  func.func @transform_3(%arg0: i32) -> (i32, i32) {
    %c0_i32 = arith.constant 0 : i32
    %c0_i32_0 = arith.constant 0 : i32
    %c0_i32_1 = arith.constant 0 : i32
    return %c0_i32, %c0_i32_0 : i32, i32
  }
  func.func @transform_4(%arg0: i32) -> (i32, i32) {
    %c0_i32 = arith.constant 0 : i32
    %c0_i32_0 = arith.constant 0 : i32
    %c0_i32_1 = arith.constant 0 : i32
    return %c0_i32, %c0_i32_0 : i32, i32
  }
  func.func @transform_5(%arg0: i32) -> (i32, i32) {
    %c0_i32 = arith.constant 0 : i32
    %c0_i32_0 = arith.constant 0 : i32
    %c0_i32_1 = arith.constant 0 : i32
    return %c0_i32, %c0_i32_0 : i32, i32
  }
  func.func @transform_6(%arg0: i32) -> (i32, i32) {
    %c0_i32 = arith.constant 0 : i32
    %c0_i32_0 = arith.constant 0 : i32
    %c0_i32_1 = arith.constant 0 : i32
    return %c0_i32, %c0_i32_0 : i32, i32
  }
  func.func @transform_7(%arg0: i32) -> (i32, i32) {
    %c0_i32 = arith.constant 0 : i32
    %c0_i32_0 = arith.constant 0 : i32
    %c0_i32_1 = arith.constant 0 : i32
    return %c0_i32, %c0_i32_0 : i32, i32
  }
  func.func @transform_8(%arg0: i32) -> (i32, i32) {
    %c0_i32 = arith.constant 0 : i32
    %c0_i32_0 = arith.constant 0 : i32
    %c0_i32_1 = arith.constant 0 : i32
    return %c0_i32, %c0_i32_0 : i32, i32
  }
  func.func @transform_9(%arg0: i32) -> (i32, i32) {
    %c0_i32 = arith.constant 0 : i32
    %c0_i32_0 = arith.constant 0 : i32
    %c0_i32_1 = arith.constant 0 : i32
    return %c0_i32, %c0_i32_0 : i32, i32
  }
  func.func @transform_10(%arg0: i32) -> (i32, i32) {
    %c0_i32 = arith.constant 0 : i32
    %c0_i32_0 = arith.constant 0 : i32
    %c0_i32_1 = arith.constant 0 : i32
    return %c0_i32, %c0_i32_0 : i32, i32
  }
  func.func @transform_11(%arg0: i32) -> (i32, i32) {
    %c0_i32 = arith.constant 0 : i32
    %c0_i32_0 = arith.constant 0 : i32
    %c0_i32_1 = arith.constant 0 : i32
    return %c0_i32, %c0_i32_0 : i32, i32
  }
  func.func @transform_12(%arg0: i32) -> (i32, i32) {
    %c0_i32 = arith.constant 0 : i32
    %c0_i32_0 = arith.constant 0 : i32
    %c0_i32_1 = arith.constant 0 : i32
    return %c0_i32, %c0_i32_0 : i32, i32
  }
  func.func @transform_13(%arg0: i32) -> (i32, i32, i32) {
    %c0_i32 = arith.constant 0 : i32
    %c0_i32_0 = arith.constant 0 : i32
    %c0_i32_1 = arith.constant 0 : i32
    return %arg0, %c0_i32, %c0_i32_0 : i32, i32, i32
  }
}

module attributes {stable_mosaic.version = 11 : i64} {
  func.func @_decoder_kernel(%arg0: i32, %arg1: memref<1x8x32xbf16, #tpu.memory_space<vmem>>, %arg2: memref<1x8x32xbf16, #tpu.memory_space<vmem>>, %arg3: memref<1x32xf32, #tpu.memory_space<vmem>>, %arg4: memref<1x32xf32, #tpu.memory_space<vmem>>, %arg5: memref<32x96xbf16, #tpu.memory_space<vmem>>, %arg6: memref<1x96xf32, #tpu.memory_space<vmem>>, %arg7: memref<32x32xbf16, #tpu.memory_space<vmem>>, %arg8: memref<1x32xf32, #tpu.memory_space<vmem>>, %arg9: memref<1x32xf32, #tpu.memory_space<vmem>>, %arg10: memref<1x32xf32, #tpu.memory_space<vmem>>, %arg11: memref<32x96xbf16, #tpu.memory_space<vmem>>, %arg12: memref<1x96xf32, #tpu.memory_space<vmem>>, %arg13: memref<32x32xbf16, #tpu.memory_space<vmem>>, %arg14: memref<1x32xf32, #tpu.memory_space<vmem>>, %arg15: memref<1x32xf32, #tpu.memory_space<vmem>>, %arg16: memref<1x32xf32, #tpu.memory_space<vmem>>, %arg17: memref<32x32xbf16, #tpu.memory_space<vmem>>, %arg18: memref<1x32xf32, #tpu.memory_space<vmem>>, %arg19: memref<32x32xbf16, #tpu.memory_space<vmem>>, %arg20: memref<1x32xf32, #tpu.memory_space<vmem>>, %arg21: memref<1x8x32xbf16, #tpu.memory_space<vmem>>) attributes {dimension_semantics = [#tpu.dimension_semantics<parallel>], iteration_bounds = array<i64: 2>, scalar_prefetch = 0 : i64, scratch_operands = 0 : i64, tpu.core_type = #tpu.core_type<tc>, window_params = [{transform_indices = @transform_0, window_bounds = array<i64: 1, 8, 32>}, {transform_indices = @transform_1, window_bounds = array<i64: 1, 8, 32>}, {pipeline_mode = #tpu.pipeline_mode<synchronous>, transform_indices = @transform_2, window_bounds = array<i64: 1, 32>}, {pipeline_mode = #tpu.pipeline_mode<synchronous>, transform_indices = @transform_3, window_bounds = array<i64: 1, 32>}, {pipeline_mode = #tpu.pipeline_mode<synchronous>, transform_indices = @transform_4, window_bounds = array<i64: 32, 96>}, {pipeline_mode = #tpu.pipeline_mode<synchronous>, transform_indices = @transform_5, window_bounds = array<i64: 1, 96>}, {pipeline_mode = #tpu.pipeline_mode<synchronous>, transform_indices = @transform_6, window_bounds = array<i64: 32, 32>}, {pipeline_mode = #tpu.pipeline_mode<synchronous>, transform_indices = @transform_7, window_bounds = array<i64: 1, 32>}, {pipeline_mode = #tpu.pipeline_mode<synchronous>, transform_indices = @transform_8, window_bounds = array<i64: 1, 32>}, {pipeline_mode = #tpu.pipeline_mode<synchronous>, transform_indices = @transform_9, window_bounds = array<i64: 1, 32>}, {pipeline_mode = #tpu.pipeline_mode<synchronous>, transform_indices = @transform_10, window_bounds = array<i64: 32, 96>}, {pipeline_mode = #tpu.pipeline_mode<synchronous>, transform_indices = @transform_11, window_bounds = array<i64: 1, 96>}, {pipeline_mode = #tpu.pipeline_mode<synchronous>, transform_indices = @transform_12, window_bounds = array<i64: 32, 32>}, {pipeline_mode = #tpu.pipeline_mode<synchronous>, transform_indices = @transform_13, window_bounds = array<i64: 1, 32>}, {pipeline_mode = #tpu.pipeline_mode<synchronous>, transform_indices = @transform_14, window_bounds = array<i64: 1, 32>}, {pipeline_mode = #tpu.pipeline_mode<synchronous>, transform_indices = @transform_15, window_bounds = array<i64: 1, 32>}, {pipeline_mode = #tpu.pipeline_mode<synchronous>, transform_indices = @transform_16, window_bounds = array<i64: 32, 32>}, {pipeline_mode = #tpu.pipeline_mode<synchronous>, transform_indices = @transform_17, window_bounds = array<i64: 1, 32>}, {pipeline_mode = #tpu.pipeline_mode<synchronous>, transform_indices = @transform_18, window_bounds = array<i64: 32, 32>}, {pipeline_mode = #tpu.pipeline_mode<synchronous>, transform_indices = @transform_19, window_bounds = array<i64: 1, 32>}, {transform_indices = @transform_20, window_bounds = array<i64: 1, 8, 32>}]} {
    %c0 = arith.constant 0 : index
    %c0_0 = arith.constant 0 : index
    %c0_1 = arith.constant 0 : index
    %0 = vector.load %arg1[%c0, %c0_0, %c0_1] : memref<1x8x32xbf16, #tpu.memory_space<vmem>>, vector<1x8x32xbf16>
    %1 = arith.extf %0 : vector<1x8x32xbf16> to vector<1x8x32xf32>
    %2 = vector.shape_cast %1 : vector<1x8x32xf32> to vector<8x32xf32>
    %c0_2 = arith.constant 0 : index
    %c0_3 = arith.constant 0 : index
    %3 = vector.load %arg3[%c0_2, %c0_3] : memref<1x32xf32, #tpu.memory_space<vmem>>, vector<1x32xf32>
    %c0_4 = arith.constant 0 : index
    %c0_5 = arith.constant 0 : index
    %4 = vector.load %arg4[%c0_4, %c0_5] : memref<1x32xf32, #tpu.memory_space<vmem>>, vector<1x32xf32>
    %cst = arith.constant dense<0.000000e+00> : vector<8xf32>
    %5 = vector.multi_reduction <add>, %2, %cst [1] : vector<8x32xf32> to vector<8xf32>
    %6 = vector.shape_cast %5 : vector<8xf32> to vector<8x1xf32>
    %cst_6 = arith.constant 3.200000e+01 : f32
    %7 = vector.broadcast %cst_6 : f32 to vector<8x1xf32>
    %8 = arith.divf %6, %7 : vector<8x1xf32>
    %9 = vector.broadcast %8 : vector<8x1xf32> to vector<8x32xf32>
    %10 = arith.subf %2, %9 : vector<8x32xf32>
    %11 = arith.mulf %10, %10 : vector<8x32xf32>
    %cst_7 = arith.constant dense<0.000000e+00> : vector<8xf32>
    %12 = vector.multi_reduction <add>, %11, %cst_7 [1] : vector<8x32xf32> to vector<8xf32>
    %13 = vector.shape_cast %12 : vector<8xf32> to vector<8x1xf32>
    %cst_8 = arith.constant 3.200000e+01 : f32
    %14 = vector.broadcast %cst_8 : f32 to vector<8x1xf32>
    %15 = arith.divf %13, %14 : vector<8x1xf32>
    %16 = vector.broadcast %8 : vector<8x1xf32> to vector<8x32xf32>
    %17 = arith.subf %2, %16 : vector<8x32xf32>
    %cst_9 = arith.constant 9.99999974E-6 : f32
    %18 = vector.broadcast %cst_9 : f32 to vector<8x1xf32>
    %19 = arith.addf %15, %18 : vector<8x1xf32>
    %20 = math.rsqrt %19 : vector<8x1xf32>
    %21 = vector.broadcast %20 : vector<8x1xf32> to vector<8x32xf32>
    %22 = arith.mulf %17, %21 : vector<8x32xf32>
    %23 = vector.broadcast %3 : vector<1x32xf32> to vector<8x32xf32>
    %24 = arith.mulf %22, %23 : vector<8x32xf32>
    %25 = vector.broadcast %4 : vector<1x32xf32> to vector<8x32xf32>
    %26 = arith.addf %24, %25 : vector<8x32xf32>
    %c0_10 = arith.constant 0 : index
    %c0_11 = arith.constant 0 : index
    %27 = vector.load %arg5[%c0_10, %c0_11] : memref<32x96xbf16, #tpu.memory_space<vmem>>, vector<32x96xbf16>
    %c0_12 = arith.constant 0 : index
    %c0_13 = arith.constant 0 : index
    %28 = vector.load %arg6[%c0_12, %c0_13] : memref<1x96xf32, #tpu.memory_space<vmem>>, vector<1x96xf32>
    %c0_14 = arith.constant 0 : index
    %c0_15 = arith.constant 0 : index
    %29 = vector.load %arg7[%c0_14, %c0_15] : memref<32x32xbf16, #tpu.memory_space<vmem>>, vector<32x32xbf16>
    %c0_16 = arith.constant 0 : index
    %c0_17 = arith.constant 0 : index
    %30 = vector.load %arg8[%c0_16, %c0_17] : memref<1x32xf32, #tpu.memory_space<vmem>>, vector<1x32xf32>
    %31 = arith.truncf %26 : vector<8x32xf32> to vector<8x32xbf16>
    %cst_18 = arith.constant dense<0.000000e+00> : vector<8x96xf32>
    %32 = tpu.matmul %31, %27, %cst_18 {dimension_numbers = #tpu.dot_dimension_numbers<[1], [0], [0], [1], [0, 0, 1, 1], [], []>} : vector<8x32xbf16>, vector<32x96xbf16>, vector<8x96xf32> -> vector<8x96xf32>
    %33 = vector.broadcast %28 : vector<1x96xf32> to vector<8x96xf32>
    %34 = arith.addf %32, %33 : vector<8x96xf32>
    %35 = vector.extract_strided_slice %34 {offsets = [0, 0], sizes = [8, 32], strides = [1, 1]} : vector<8x96xf32> to vector<8x32xf32>
    %36 = vector.extract_strided_slice %34 {offsets = [0, 32], sizes = [8, 32], strides = [1, 1]} : vector<8x96xf32> to vector<8x32xf32>
    %37 = vector.extract_strided_slice %34 {offsets = [0, 64], sizes = [8, 32], strides = [1, 1]} : vector<8x96xf32> to vector<8x32xf32>
    %38 = vector.shape_cast %35 : vector<8x32xf32> to vector<1x8x32xf32>
    %39 = vector.shape_cast %36 : vector<8x32xf32> to vector<1x8x32xf32>
    %40 = vector.shape_cast %37 : vector<8x32xf32> to vector<1x8x32xf32>
    %41 = tpu.iota {dimensions = array<i32: 0>} : vector<8x8xi32>
    %42 = tpu.iota {dimensions = array<i32: 1>} : vector<8x8xi32>
    %43 = arith.cmpi sgt, %42, %41 : vector<8x8xi32>
    %cst_19 = arith.constant -1.000000e+30 : f32
    %cst_20 = arith.constant 0.000000e+00 : f32
    %44 = vector.broadcast %cst_19 : f32 to vector<8x8xf32>
    %45 = vector.broadcast %cst_20 : f32 to vector<8x8xf32>
    %46 = arith.select %43, %44, %45 : vector<8x8xi1>, vector<8x8xf32>
    %47 = vector.shape_cast %46 : vector<8x8xf32> to vector<1x8x8xf32>
    %48 = vector.extract_strided_slice %38 {offsets = [0, 0, 0], sizes = [1, 8, 16], strides = [1, 1, 1]} : vector<1x8x32xf32> to vector<1x8x16xf32>
    %cst_21 = arith.constant 2.500000e-01 : f32
    %49 = vector.broadcast %cst_21 : f32 to vector<1x8x16xf32>
    %50 = arith.mulf %48, %49 : vector<1x8x16xf32>
    %51 = vector.extract_strided_slice %39 {offsets = [0, 0, 0], sizes = [1, 8, 16], strides = [1, 1, 1]} : vector<1x8x32xf32> to vector<1x8x16xf32>
    %52 = vector.extract_strided_slice %40 {offsets = [0, 0, 0], sizes = [1, 8, 16], strides = [1, 1, 1]} : vector<1x8x32xf32> to vector<1x8x16xf32>
    %53 = arith.truncf %50 : vector<1x8x16xf32> to vector<1x8x16xbf16>
    %54 = arith.truncf %51 : vector<1x8x16xf32> to vector<1x8x16xbf16>
    "tpu.trace_start"() <{level = 10 : i32, message = "bqd,bkd->bqk"}> : () -> ()
    %cst_22 = arith.constant dense<0.000000e+00> : vector<1x8x8xf32>
    %55 = tpu.matmul %53, %54, %cst_22 {dimension_numbers = #tpu.dot_dimension_numbers<[2], [2], [1], [1], [0, 0, 0, 1, 1, 1], [0], [0]>} : vector<1x8x16xbf16>, vector<1x8x16xbf16>, vector<1x8x8xf32> -> vector<1x8x8xf32>
    "tpu.trace_stop"() : () -> ()
    %56 = arith.addf %55, %47 : vector<1x8x8xf32>
    %cst_23 = arith.constant dense<0xFF800000> : vector<1x8xf32>
    %57 = vector.multi_reduction <maximumf>, %56, %cst_23 [2] : vector<1x8x8xf32> to vector<1x8xf32>
    %58 = vector.shape_cast %57 : vector<1x8xf32> to vector<1x8x1xf32>
    %59 = vector.broadcast %58 : vector<1x8x1xf32> to vector<1x8x8xf32>
    %60 = arith.subf %56, %59 : vector<1x8x8xf32>
    %61 = math.exp %60 : vector<1x8x8xf32>
    %cst_24 = arith.constant dense<0.000000e+00> : vector<1x8xf32>
    %62 = vector.multi_reduction <add>, %61, %cst_24 [2] : vector<1x8x8xf32> to vector<1x8xf32>
    %63 = vector.shape_cast %62 : vector<1x8xf32> to vector<1x8x1xf32>
    %64 = tpu.reciprocal %63 {approx = true} : vector<1x8x1xf32> -> vector<1x8x1xf32>
    %65 = vector.broadcast %64 : vector<1x8x1xf32> to vector<1x8x8xf32>
    %66 = arith.mulf %61, %65 : vector<1x8x8xf32>
    %67 = arith.truncf %66 : vector<1x8x8xf32> to vector<1x8x8xbf16>
    %68 = arith.truncf %52 : vector<1x8x16xf32> to vector<1x8x16xbf16>
    "tpu.trace_start"() <{level = 10 : i32, message = "bqk,bkd->bqd"}> : () -> ()
    %cst_25 = arith.constant dense<0.000000e+00> : vector<1x8x16xf32>
    %69 = tpu.matmul %67, %68, %cst_25 {dimension_numbers = #tpu.dot_dimension_numbers<[2], [1], [1], [2], [0, 0, 0, 1, 1, 2], [0], [0]>} : vector<1x8x8xbf16>, vector<1x8x16xbf16>, vector<1x8x16xf32> -> vector<1x8x16xf32>
    "tpu.trace_stop"() : () -> ()
    %70 = vector.extract_strided_slice %38 {offsets = [0, 0, 16], sizes = [1, 8, 16], strides = [1, 1, 1]} : vector<1x8x32xf32> to vector<1x8x16xf32>
    %cst_26 = arith.constant 2.500000e-01 : f32
    %71 = vector.broadcast %cst_26 : f32 to vector<1x8x16xf32>
    %72 = arith.mulf %70, %71 : vector<1x8x16xf32>
    %73 = vector.extract_strided_slice %39 {offsets = [0, 0, 16], sizes = [1, 8, 16], strides = [1, 1, 1]} : vector<1x8x32xf32> to vector<1x8x16xf32>
    %74 = vector.extract_strided_slice %40 {offsets = [0, 0, 16], sizes = [1, 8, 16], strides = [1, 1, 1]} : vector<1x8x32xf32> to vector<1x8x16xf32>
    %75 = arith.truncf %72 : vector<1x8x16xf32> to vector<1x8x16xbf16>
    %76 = arith.truncf %73 : vector<1x8x16xf32> to vector<1x8x16xbf16>
    "tpu.trace_start"() <{level = 10 : i32, message = "bqd,bkd->bqk"}> : () -> ()
    %cst_27 = arith.constant dense<0.000000e+00> : vector<1x8x8xf32>
    %77 = tpu.matmul %75, %76, %cst_27 {dimension_numbers = #tpu.dot_dimension_numbers<[2], [2], [1], [1], [0, 0, 0, 1, 1, 1], [0], [0]>} : vector<1x8x16xbf16>, vector<1x8x16xbf16>, vector<1x8x8xf32> -> vector<1x8x8xf32>
    "tpu.trace_stop"() : () -> ()
    %78 = arith.addf %77, %47 : vector<1x8x8xf32>
    %cst_28 = arith.constant dense<0xFF800000> : vector<1x8xf32>
    %79 = vector.multi_reduction <maximumf>, %78, %cst_28 [2] : vector<1x8x8xf32> to vector<1x8xf32>
    %80 = vector.shape_cast %79 : vector<1x8xf32> to vector<1x8x1xf32>
    %81 = vector.broadcast %80 : vector<1x8x1xf32> to vector<1x8x8xf32>
    %82 = arith.subf %78, %81 : vector<1x8x8xf32>
    %83 = math.exp %82 : vector<1x8x8xf32>
    %cst_29 = arith.constant dense<0.000000e+00> : vector<1x8xf32>
    %84 = vector.multi_reduction <add>, %83, %cst_29 [2] : vector<1x8x8xf32> to vector<1x8xf32>
    %85 = vector.shape_cast %84 : vector<1x8xf32> to vector<1x8x1xf32>
    %86 = tpu.reciprocal %85 {approx = true} : vector<1x8x1xf32> -> vector<1x8x1xf32>
    %87 = vector.broadcast %86 : vector<1x8x1xf32> to vector<1x8x8xf32>
    %88 = arith.mulf %83, %87 : vector<1x8x8xf32>
    %89 = arith.truncf %88 : vector<1x8x8xf32> to vector<1x8x8xbf16>
    %90 = arith.truncf %74 : vector<1x8x16xf32> to vector<1x8x16xbf16>
    "tpu.trace_start"() <{level = 10 : i32, message = "bqk,bkd->bqd"}> : () -> ()
    %cst_30 = arith.constant dense<0.000000e+00> : vector<1x8x16xf32>
    %91 = tpu.matmul %89, %90, %cst_30 {dimension_numbers = #tpu.dot_dimension_numbers<[2], [1], [1], [2], [0, 0, 0, 1, 1, 2], [0], [0]>} : vector<1x8x8xbf16>, vector<1x8x16xbf16>, vector<1x8x16xf32> -> vector<1x8x16xf32>
    "tpu.trace_stop"() : () -> ()
    %92 = tpu.concatenate %69, %91 in 2 : vector<1x8x16xf32>, vector<1x8x16xf32> -> vector<1x8x32xf32>
    %93 = vector.shape_cast %92 : vector<1x8x32xf32> to vector<8x32xf32>
    %94 = arith.truncf %93 : vector<8x32xf32> to vector<8x32xbf16>
    %cst_31 = arith.constant dense<0.000000e+00> : vector<8x32xf32>
    %95 = tpu.matmul %94, %29, %cst_31 {dimension_numbers = #tpu.dot_dimension_numbers<[1], [0], [0], [1], [0, 0, 1, 1], [], []>} : vector<8x32xbf16>, vector<32x32xbf16>, vector<8x32xf32> -> vector<8x32xf32>
    %96 = vector.broadcast %30 : vector<1x32xf32> to vector<8x32xf32>
    %97 = arith.addf %95, %96 : vector<8x32xf32>
    %98 = arith.addf %26, %97 : vector<8x32xf32>
    %c0_32 = arith.constant 0 : index
    %c0_33 = arith.constant 0 : index
    %c0_34 = arith.constant 0 : index
    %99 = vector.load %arg2[%c0_32, %c0_33, %c0_34] : memref<1x8x32xbf16, #tpu.memory_space<vmem>>, vector<1x8x32xbf16>
    %100 = arith.extf %99 : vector<1x8x32xbf16> to vector<1x8x32xf32>
    %101 = vector.shape_cast %100 : vector<1x8x32xf32> to vector<8x32xf32>
    %c0_35 = arith.constant 0 : index
    %c0_36 = arith.constant 0 : index
    %102 = vector.load %arg9[%c0_35, %c0_36] : memref<1x32xf32, #tpu.memory_space<vmem>>, vector<1x32xf32>
    %c0_37 = arith.constant 0 : index
    %c0_38 = arith.constant 0 : index
    %103 = vector.load %arg10[%c0_37, %c0_38] : memref<1x32xf32, #tpu.memory_space<vmem>>, vector<1x32xf32>
    %cst_39 = arith.constant dense<0.000000e+00> : vector<8xf32>
    %104 = vector.multi_reduction <add>, %101, %cst_39 [1] : vector<8x32xf32> to vector<8xf32>
    %105 = vector.shape_cast %104 : vector<8xf32> to vector<8x1xf32>
    %cst_40 = arith.constant 3.200000e+01 : f32
    %106 = vector.broadcast %cst_40 : f32 to vector<8x1xf32>
    %107 = arith.divf %105, %106 : vector<8x1xf32>
    %108 = vector.broadcast %107 : vector<8x1xf32> to vector<8x32xf32>
    %109 = arith.subf %101, %108 : vector<8x32xf32>
    %110 = arith.mulf %109, %109 : vector<8x32xf32>
    %cst_41 = arith.constant dense<0.000000e+00> : vector<8xf32>
    %111 = vector.multi_reduction <add>, %110, %cst_41 [1] : vector<8x32xf32> to vector<8xf32>
    %112 = vector.shape_cast %111 : vector<8xf32> to vector<8x1xf32>
    %cst_42 = arith.constant 3.200000e+01 : f32
    %113 = vector.broadcast %cst_42 : f32 to vector<8x1xf32>
    %114 = arith.divf %112, %113 : vector<8x1xf32>
    %115 = vector.broadcast %107 : vector<8x1xf32> to vector<8x32xf32>
    %116 = arith.subf %101, %115 : vector<8x32xf32>
    %cst_43 = arith.constant 9.99999974E-6 : f32
    %117 = vector.broadcast %cst_43 : f32 to vector<8x1xf32>
    %118 = arith.addf %114, %117 : vector<8x1xf32>
    %119 = math.rsqrt %118 : vector<8x1xf32>
    %120 = vector.broadcast %119 : vector<8x1xf32> to vector<8x32xf32>
    %121 = arith.mulf %116, %120 : vector<8x32xf32>
    %122 = vector.broadcast %102 : vector<1x32xf32> to vector<8x32xf32>
    %123 = arith.mulf %121, %122 : vector<8x32xf32>
    %124 = vector.broadcast %103 : vector<1x32xf32> to vector<8x32xf32>
    %125 = arith.addf %123, %124 : vector<8x32xf32>
    %c0_44 = arith.constant 0 : index
    %c0_45 = arith.constant 0 : index
    %126 = vector.load %arg11[%c0_44, %c0_45] : memref<32x96xbf16, #tpu.memory_space<vmem>>, vector<32x96xbf16>
    %c0_46 = arith.constant 0 : index
    %c0_47 = arith.constant 0 : index
    %127 = vector.load %arg12[%c0_46, %c0_47] : memref<1x96xf32, #tpu.memory_space<vmem>>, vector<1x96xf32>
    %c0_48 = arith.constant 0 : index
    %c0_49 = arith.constant 0 : index
    %128 = vector.load %arg13[%c0_48, %c0_49] : memref<32x32xbf16, #tpu.memory_space<vmem>>, vector<32x32xbf16>
    %c0_50 = arith.constant 0 : index
    %c0_51 = arith.constant 0 : index
    %129 = vector.load %arg14[%c0_50, %c0_51] : memref<1x32xf32, #tpu.memory_space<vmem>>, vector<1x32xf32>
    %130 = arith.truncf %98 : vector<8x32xf32> to vector<8x32xbf16>
    %131 = vector.extract_strided_slice %126 {offsets = [0, 0], sizes = [32, 32], strides = [1, 1]} : vector<32x96xbf16> to vector<32x32xbf16>
    %cst_52 = arith.constant dense<0.000000e+00> : vector<8x32xf32>
    %132 = tpu.matmul %130, %131, %cst_52 {dimension_numbers = #tpu.dot_dimension_numbers<[1], [0], [0], [1], [0, 0, 1, 1], [], []>} : vector<8x32xbf16>, vector<32x32xbf16>, vector<8x32xf32> -> vector<8x32xf32>
    %133 = vector.extract_strided_slice %127 {offsets = [0, 0], sizes = [1, 32], strides = [1, 1]} : vector<1x96xf32> to vector<1x32xf32>
    %134 = vector.broadcast %133 : vector<1x32xf32> to vector<8x32xf32>
    %135 = arith.addf %132, %134 : vector<8x32xf32>
    %136 = arith.truncf %125 : vector<8x32xf32> to vector<8x32xbf16>
    %137 = vector.extract_strided_slice %126 {offsets = [0, 32], sizes = [32, 64], strides = [1, 1]} : vector<32x96xbf16> to vector<32x64xbf16>
    %cst_53 = arith.constant dense<0.000000e+00> : vector<8x64xf32>
    %138 = tpu.matmul %136, %137, %cst_53 {dimension_numbers = #tpu.dot_dimension_numbers<[1], [0], [0], [1], [0, 0, 1, 1], [], []>} : vector<8x32xbf16>, vector<32x64xbf16>, vector<8x64xf32> -> vector<8x64xf32>
    %139 = vector.extract_strided_slice %127 {offsets = [0, 32], sizes = [1, 64], strides = [1, 1]} : vector<1x96xf32> to vector<1x64xf32>
    %140 = vector.broadcast %139 : vector<1x64xf32> to vector<8x64xf32>
    %141 = arith.addf %138, %140 : vector<8x64xf32>
    %142 = vector.extract_strided_slice %141 {offsets = [0, 0], sizes = [8, 32], strides = [1, 1]} : vector<8x64xf32> to vector<8x32xf32>
    %143 = vector.extract_strided_slice %141 {offsets = [0, 32], sizes = [8, 32], strides = [1, 1]} : vector<8x64xf32> to vector<8x32xf32>
    %144 = vector.shape_cast %135 : vector<8x32xf32> to vector<1x8x32xf32>
    %145 = vector.shape_cast %142 : vector<8x32xf32> to vector<1x8x32xf32>
    %146 = vector.shape_cast %143 : vector<8x32xf32> to vector<1x8x32xf32>
    %147 = tpu.iota {dimensions = array<i32: 0>} : vector<8x8xi32>
    %148 = tpu.iota {dimensions = array<i32: 1>} : vector<8x8xi32>
    %149 = arith.cmpi sgt, %148, %147 : vector<8x8xi32>
    %cst_54 = arith.constant -1.000000e+30 : f32
    %cst_55 = arith.constant 0.000000e+00 : f32
    %150 = vector.broadcast %cst_54 : f32 to vector<8x8xf32>
    %151 = vector.broadcast %cst_55 : f32 to vector<8x8xf32>
    %152 = arith.select %149, %150, %151 : vector<8x8xi1>, vector<8x8xf32>
    %153 = vector.shape_cast %152 : vector<8x8xf32> to vector<1x8x8xf32>
    %154 = vector.extract_strided_slice %144 {offsets = [0, 0, 0], sizes = [1, 8, 16], strides = [1, 1, 1]} : vector<1x8x32xf32> to vector<1x8x16xf32>
    %cst_56 = arith.constant 2.500000e-01 : f32
    %155 = vector.broadcast %cst_56 : f32 to vector<1x8x16xf32>
    %156 = arith.mulf %154, %155 : vector<1x8x16xf32>
    %157 = vector.extract_strided_slice %145 {offsets = [0, 0, 0], sizes = [1, 8, 16], strides = [1, 1, 1]} : vector<1x8x32xf32> to vector<1x8x16xf32>
    %158 = vector.extract_strided_slice %146 {offsets = [0, 0, 0], sizes = [1, 8, 16], strides = [1, 1, 1]} : vector<1x8x32xf32> to vector<1x8x16xf32>
    %159 = arith.truncf %156 : vector<1x8x16xf32> to vector<1x8x16xbf16>
    %160 = arith.truncf %157 : vector<1x8x16xf32> to vector<1x8x16xbf16>
    "tpu.trace_start"() <{level = 10 : i32, message = "bqd,bkd->bqk"}> : () -> ()
    %cst_57 = arith.constant dense<0.000000e+00> : vector<1x8x8xf32>
    %161 = tpu.matmul %159, %160, %cst_57 {dimension_numbers = #tpu.dot_dimension_numbers<[2], [2], [1], [1], [0, 0, 0, 1, 1, 1], [0], [0]>} : vector<1x8x16xbf16>, vector<1x8x16xbf16>, vector<1x8x8xf32> -> vector<1x8x8xf32>
    "tpu.trace_stop"() : () -> ()
    %162 = arith.addf %161, %153 : vector<1x8x8xf32>
    %cst_58 = arith.constant dense<0xFF800000> : vector<1x8xf32>
    %163 = vector.multi_reduction <maximumf>, %162, %cst_58 [2] : vector<1x8x8xf32> to vector<1x8xf32>
    %164 = vector.shape_cast %163 : vector<1x8xf32> to vector<1x8x1xf32>
    %165 = vector.broadcast %164 : vector<1x8x1xf32> to vector<1x8x8xf32>
    %166 = arith.subf %162, %165 : vector<1x8x8xf32>
    %167 = math.exp %166 : vector<1x8x8xf32>
    %cst_59 = arith.constant dense<0.000000e+00> : vector<1x8xf32>
    %168 = vector.multi_reduction <add>, %167, %cst_59 [2] : vector<1x8x8xf32> to vector<1x8xf32>
    %169 = vector.shape_cast %168 : vector<1x8xf32> to vector<1x8x1xf32>
    %170 = tpu.reciprocal %169 {approx = true} : vector<1x8x1xf32> -> vector<1x8x1xf32>
    %171 = vector.broadcast %170 : vector<1x8x1xf32> to vector<1x8x8xf32>
    %172 = arith.mulf %167, %171 : vector<1x8x8xf32>
    %173 = arith.truncf %172 : vector<1x8x8xf32> to vector<1x8x8xbf16>
    %174 = arith.truncf %158 : vector<1x8x16xf32> to vector<1x8x16xbf16>
    "tpu.trace_start"() <{level = 10 : i32, message = "bqk,bkd->bqd"}> : () -> ()
    %cst_60 = arith.constant dense<0.000000e+00> : vector<1x8x16xf32>
    %175 = tpu.matmul %173, %174, %cst_60 {dimension_numbers = #tpu.dot_dimension_numbers<[2], [1], [1], [2], [0, 0, 0, 1, 1, 2], [0], [0]>} : vector<1x8x8xbf16>, vector<1x8x16xbf16>, vector<1x8x16xf32> -> vector<1x8x16xf32>
    "tpu.trace_stop"() : () -> ()
    %176 = vector.extract_strided_slice %144 {offsets = [0, 0, 16], sizes = [1, 8, 16], strides = [1, 1, 1]} : vector<1x8x32xf32> to vector<1x8x16xf32>
    %cst_61 = arith.constant 2.500000e-01 : f32
    %177 = vector.broadcast %cst_61 : f32 to vector<1x8x16xf32>
    %178 = arith.mulf %176, %177 : vector<1x8x16xf32>
    %179 = vector.extract_strided_slice %145 {offsets = [0, 0, 16], sizes = [1, 8, 16], strides = [1, 1, 1]} : vector<1x8x32xf32> to vector<1x8x16xf32>
    %180 = vector.extract_strided_slice %146 {offsets = [0, 0, 16], sizes = [1, 8, 16], strides = [1, 1, 1]} : vector<1x8x32xf32> to vector<1x8x16xf32>
    %181 = arith.truncf %178 : vector<1x8x16xf32> to vector<1x8x16xbf16>
    %182 = arith.truncf %179 : vector<1x8x16xf32> to vector<1x8x16xbf16>
    "tpu.trace_start"() <{level = 10 : i32, message = "bqd,bkd->bqk"}> : () -> ()
    %cst_62 = arith.constant dense<0.000000e+00> : vector<1x8x8xf32>
    %183 = tpu.matmul %181, %182, %cst_62 {dimension_numbers = #tpu.dot_dimension_numbers<[2], [2], [1], [1], [0, 0, 0, 1, 1, 1], [0], [0]>} : vector<1x8x16xbf16>, vector<1x8x16xbf16>, vector<1x8x8xf32> -> vector<1x8x8xf32>
    "tpu.trace_stop"() : () -> ()
    %184 = arith.addf %183, %153 : vector<1x8x8xf32>
    %cst_63 = arith.constant dense<0xFF800000> : vector<1x8xf32>
    %185 = vector.multi_reduction <maximumf>, %184, %cst_63 [2] : vector<1x8x8xf32> to vector<1x8xf32>
    %186 = vector.shape_cast %185 : vector<1x8xf32> to vector<1x8x1xf32>
    %187 = vector.broadcast %186 : vector<1x8x1xf32> to vector<1x8x8xf32>
    %188 = arith.subf %184, %187 : vector<1x8x8xf32>
    %189 = math.exp %188 : vector<1x8x8xf32>
    %cst_64 = arith.constant dense<0.000000e+00> : vector<1x8xf32>
    %190 = vector.multi_reduction <add>, %189, %cst_64 [2] : vector<1x8x8xf32> to vector<1x8xf32>
    %191 = vector.shape_cast %190 : vector<1x8xf32> to vector<1x8x1xf32>
    %192 = tpu.reciprocal %191 {approx = true} : vector<1x8x1xf32> -> vector<1x8x1xf32>
    %193 = vector.broadcast %192 : vector<1x8x1xf32> to vector<1x8x8xf32>
    %194 = arith.mulf %189, %193 : vector<1x8x8xf32>
    %195 = arith.truncf %194 : vector<1x8x8xf32> to vector<1x8x8xbf16>
    %196 = arith.truncf %180 : vector<1x8x16xf32> to vector<1x8x16xbf16>
    "tpu.trace_start"() <{level = 10 : i32, message = "bqk,bkd->bqd"}> : () -> ()
    %cst_65 = arith.constant dense<0.000000e+00> : vector<1x8x16xf32>
    %197 = tpu.matmul %195, %196, %cst_65 {dimension_numbers = #tpu.dot_dimension_numbers<[2], [1], [1], [2], [0, 0, 0, 1, 1, 2], [0], [0]>} : vector<1x8x8xbf16>, vector<1x8x16xbf16>, vector<1x8x16xf32> -> vector<1x8x16xf32>
    "tpu.trace_stop"() : () -> ()
    %198 = tpu.concatenate %175, %197 in 2 : vector<1x8x16xf32>, vector<1x8x16xf32> -> vector<1x8x32xf32>
    %199 = vector.shape_cast %198 : vector<1x8x32xf32> to vector<8x32xf32>
    %200 = arith.truncf %199 : vector<8x32xf32> to vector<8x32xbf16>
    %cst_66 = arith.constant dense<0.000000e+00> : vector<8x32xf32>
    %201 = tpu.matmul %200, %128, %cst_66 {dimension_numbers = #tpu.dot_dimension_numbers<[1], [0], [0], [1], [0, 0, 1, 1], [], []>} : vector<8x32xbf16>, vector<32x32xbf16>, vector<8x32xf32> -> vector<8x32xf32>
    %202 = vector.broadcast %129 : vector<1x32xf32> to vector<8x32xf32>
    %203 = arith.addf %201, %202 : vector<8x32xf32>
    %204 = arith.addf %98, %203 : vector<8x32xf32>
    %c0_67 = arith.constant 0 : index
    %c0_68 = arith.constant 0 : index
    %205 = vector.load %arg15[%c0_67, %c0_68] : memref<1x32xf32, #tpu.memory_space<vmem>>, vector<1x32xf32>
    %c0_69 = arith.constant 0 : index
    %c0_70 = arith.constant 0 : index
    %206 = vector.load %arg16[%c0_69, %c0_70] : memref<1x32xf32, #tpu.memory_space<vmem>>, vector<1x32xf32>
    %cst_71 = arith.constant dense<0.000000e+00> : vector<8xf32>
    %207 = vector.multi_reduction <add>, %204, %cst_71 [1] : vector<8x32xf32> to vector<8xf32>
    %208 = vector.shape_cast %207 : vector<8xf32> to vector<8x1xf32>
    %cst_72 = arith.constant 3.200000e+01 : f32
    %209 = vector.broadcast %cst_72 : f32 to vector<8x1xf32>
    %210 = arith.divf %208, %209 : vector<8x1xf32>
    %211 = vector.broadcast %210 : vector<8x1xf32> to vector<8x32xf32>
    %212 = arith.subf %204, %211 : vector<8x32xf32>
    %213 = arith.mulf %212, %212 : vector<8x32xf32>
    %cst_73 = arith.constant dense<0.000000e+00> : vector<8xf32>
    %214 = vector.multi_reduction <add>, %213, %cst_73 [1] : vector<8x32xf32> to vector<8xf32>
    %215 = vector.shape_cast %214 : vector<8xf32> to vector<8x1xf32>
    %cst_74 = arith.constant 3.200000e+01 : f32
    %216 = vector.broadcast %cst_74 : f32 to vector<8x1xf32>
    %217 = arith.divf %215, %216 : vector<8x1xf32>
    %218 = vector.broadcast %210 : vector<8x1xf32> to vector<8x32xf32>
    %219 = arith.subf %204, %218 : vector<8x32xf32>
    %cst_75 = arith.constant 9.99999974E-6 : f32
    %220 = vector.broadcast %cst_75 : f32 to vector<8x1xf32>
    %221 = arith.addf %217, %220 : vector<8x1xf32>
    %222 = math.rsqrt %221 : vector<8x1xf32>
    %223 = vector.broadcast %222 : vector<8x1xf32> to vector<8x32xf32>
    %224 = arith.mulf %219, %223 : vector<8x32xf32>
    %225 = vector.broadcast %205 : vector<1x32xf32> to vector<8x32xf32>
    %226 = arith.mulf %224, %225 : vector<8x32xf32>
    %227 = vector.broadcast %206 : vector<1x32xf32> to vector<8x32xf32>
    %228 = arith.addf %226, %227 : vector<8x32xf32>
    %c0_76 = arith.constant 0 : index
    %c0_77 = arith.constant 0 : index
    %229 = vector.load %arg17[%c0_76, %c0_77] : memref<32x32xbf16, #tpu.memory_space<vmem>>, vector<32x32xbf16>
    %c0_78 = arith.constant 0 : index
    %c0_79 = arith.constant 0 : index
    %230 = vector.load %arg18[%c0_78, %c0_79] : memref<1x32xf32, #tpu.memory_space<vmem>>, vector<1x32xf32>
    %c0_80 = arith.constant 0 : index
    %c0_81 = arith.constant 0 : index
    %231 = vector.load %arg19[%c0_80, %c0_81] : memref<32x32xbf16, #tpu.memory_space<vmem>>, vector<32x32xbf16>
    %c0_82 = arith.constant 0 : index
    %c0_83 = arith.constant 0 : index
    %232 = vector.load %arg20[%c0_82, %c0_83] : memref<1x32xf32, #tpu.memory_space<vmem>>, vector<1x32xf32>
    %233 = arith.truncf %228 : vector<8x32xf32> to vector<8x32xbf16>
    %cst_84 = arith.constant dense<0.000000e+00> : vector<8x32xf32>
    %234 = tpu.matmul %233, %229, %cst_84 {dimension_numbers = #tpu.dot_dimension_numbers<[1], [0], [0], [1], [0, 0, 1, 1], [], []>} : vector<8x32xbf16>, vector<32x32xbf16>, vector<8x32xf32> -> vector<8x32xf32>
    %235 = vector.broadcast %230 : vector<1x32xf32> to vector<8x32xf32>
    %236 = arith.addf %234, %235 : vector<8x32xf32>
    %cst_85 = arith.constant 0.000000e+00 : f32
    %237 = vector.broadcast %cst_85 : f32 to vector<8x32xf32>
    %238 = arith.maximumf %236, %237 : vector<8x32xf32>
    %239 = arith.truncf %238 : vector<8x32xf32> to vector<8x32xbf16>
    %cst_86 = arith.constant dense<0.000000e+00> : vector<8x32xf32>
    %240 = tpu.matmul %239, %231, %cst_86 {dimension_numbers = #tpu.dot_dimension_numbers<[1], [0], [0], [1], [0, 0, 1, 1], [], []>} : vector<8x32xbf16>, vector<32x32xbf16>, vector<8x32xf32> -> vector<8x32xf32>
    %241 = vector.broadcast %232 : vector<1x32xf32> to vector<8x32xf32>
    %242 = arith.addf %240, %241 : vector<8x32xf32>
    %243 = arith.addf %242, %228 : vector<8x32xf32>
    %244 = vector.shape_cast %243 : vector<8x32xf32> to vector<1x8x32xf32>
    %245 = arith.truncf %244 : vector<1x8x32xf32> to vector<1x8x32xbf16>
    %c0_87 = arith.constant 0 : index
    %c0_88 = arith.constant 0 : index
    %c0_89 = arith.constant 0 : index
    %246 = vector.load %arg21[%c0_87, %c0_88, %c0_89] : memref<1x8x32xbf16, #tpu.memory_space<vmem>>, vector<1x8x32xbf16>
    tpu.vector_store %arg21[%c0_87, %c0_88, %c0_89], %245 {strides = array<i32>} : memref<1x8x32xbf16, #tpu.memory_space<vmem>>, vector<1x8x32xbf16>,
    return
  }
  func.func @transform_0(%arg0: i32) -> (i32, i32, i32) {
    %c0_i32 = arith.constant 0 : i32
    %c0_i32_0 = arith.constant 0 : i32
    %c0_i32_1 = arith.constant 0 : i32
    return %arg0, %c0_i32, %c0_i32_0 : i32, i32, i32
  }
  func.func @transform_1(%arg0: i32) -> (i32, i32, i32) {
    %c0_i32 = arith.constant 0 : i32
    %c0_i32_0 = arith.constant 0 : i32
    %c0_i32_1 = arith.constant 0 : i32
    return %arg0, %c0_i32, %c0_i32_0 : i32, i32, i32
  }
  func.func @transform_2(%arg0: i32) -> (i32, i32) {
    %c0_i32 = arith.constant 0 : i32
    %c0_i32_0 = arith.constant 0 : i32
    %c0_i32_1 = arith.constant 0 : i32
    return %c0_i32, %c0_i32_0 : i32, i32
  }
  func.func @transform_3(%arg0: i32) -> (i32, i32) {
    %c0_i32 = arith.constant 0 : i32
    %c0_i32_0 = arith.constant 0 : i32
    %c0_i32_1 = arith.constant 0 : i32
    return %c0_i32, %c0_i32_0 : i32, i32
  }
  func.func @transform_4(%arg0: i32) -> (i32, i32) {
    %c0_i32 = arith.constant 0 : i32
    %c0_i32_0 = arith.constant 0 : i32
    %c0_i32_1 = arith.constant 0 : i32
    return %c0_i32, %c0_i32_0 : i32, i32
  }
  func.func @transform_5(%arg0: i32) -> (i32, i32) {
    %c0_i32 = arith.constant 0 : i32
    %c0_i32_0 = arith.constant 0 : i32
    %c0_i32_1 = arith.constant 0 : i32
    return %c0_i32, %c0_i32_0 : i32, i32
  }
  func.func @transform_6(%arg0: i32) -> (i32, i32) {
    %c0_i32 = arith.constant 0 : i32
    %c0_i32_0 = arith.constant 0 : i32
    %c0_i32_1 = arith.constant 0 : i32
    return %c0_i32, %c0_i32_0 : i32, i32
  }
  func.func @transform_7(%arg0: i32) -> (i32, i32) {
    %c0_i32 = arith.constant 0 : i32
    %c0_i32_0 = arith.constant 0 : i32
    %c0_i32_1 = arith.constant 0 : i32
    return %c0_i32, %c0_i32_0 : i32, i32
  }
  func.func @transform_8(%arg0: i32) -> (i32, i32) {
    %c0_i32 = arith.constant 0 : i32
    %c0_i32_0 = arith.constant 0 : i32
    %c0_i32_1 = arith.constant 0 : i32
    return %c0_i32, %c0_i32_0 : i32, i32
  }
  func.func @transform_9(%arg0: i32) -> (i32, i32) {
    %c0_i32 = arith.constant 0 : i32
    %c0_i32_0 = arith.constant 0 : i32
    %c0_i32_1 = arith.constant 0 : i32
    return %c0_i32, %c0_i32_0 : i32, i32
  }
  func.func @transform_10(%arg0: i32) -> (i32, i32) {
    %c0_i32 = arith.constant 0 : i32
    %c0_i32_0 = arith.constant 0 : i32
    %c0_i32_1 = arith.constant 0 : i32
    return %c0_i32, %c0_i32_0 : i32, i32
  }
  func.func @transform_11(%arg0: i32) -> (i32, i32) {
    %c0_i32 = arith.constant 0 : i32
    %c0_i32_0 = arith.constant 0 : i32
    %c0_i32_1 = arith.constant 0 : i32
    return %c0_i32, %c0_i32_0 : i32, i32
  }
  func.func @transform_12(%arg0: i32) -> (i32, i32) {
    %c0_i32 = arith.constant 0 : i32
    %c0_i32_0 = arith.constant 0 : i32
    %c0_i32_1 = arith.constant 0 : i32
    return %c0_i32, %c0_i32_0 : i32, i32
  }
  func.func @transform_13(%arg0: i32) -> (i32, i32) {
    %c0_i32 = arith.constant 0 : i32
    %c0_i32_0 = arith.constant 0 : i32
    %c0_i32_1 = arith.constant 0 : i32
    return %c0_i32, %c0_i32_0 : i32, i32
  }
  func.func @transform_14(%arg0: i32) -> (i32, i32) {
    %c0_i32 = arith.constant 0 : i32
    %c0_i32_0 = arith.constant 0 : i32
    %c0_i32_1 = arith.constant 0 : i32
    return %c0_i32, %c0_i32_0 : i32, i32
  }
  func.func @transform_15(%arg0: i32) -> (i32, i32) {
    %c0_i32 = arith.constant 0 : i32
    %c0_i32_0 = arith.constant 0 : i32
    %c0_i32_1 = arith.constant 0 : i32
    return %c0_i32, %c0_i32_0 : i32, i32
  }
  func.func @transform_16(%arg0: i32) -> (i32, i32) {
    %c0_i32 = arith.constant 0 : i32
    %c0_i32_0 = arith.constant 0 : i32
    %c0_i32_1 = arith.constant 0 : i32
    return %c0_i32, %c0_i32_0 : i32, i32
  }
  func.func @transform_17(%arg0: i32) -> (i32, i32) {
    %c0_i32 = arith.constant 0 : i32
    %c0_i32_0 = arith.constant 0 : i32
    %c0_i32_1 = arith.constant 0 : i32
    return %c0_i32, %c0_i32_0 : i32, i32
  }
  func.func @transform_18(%arg0: i32) -> (i32, i32) {
    %c0_i32 = arith.constant 0 : i32
    %c0_i32_0 = arith.constant 0 : i32
    %c0_i32_1 = arith.constant 0 : i32
    return %c0_i32, %c0_i32_0 : i32, i32
  }
  func.func @transform_19(%arg0: i32) -> (i32, i32) {
    %c0_i32 = arith.constant 0 : i32
    %c0_i32_0 = arith.constant 0 : i32
    %c0_i32_1 = arith.constant 0 : i32
    return %c0_i32, %c0_i32_0 : i32, i32
  }
  func.func @transform_20(%arg0: i32) -> (i32, i32, i32) {
    %c0_i32 = arith.constant 0 : i32
    %c0_i32_0 = arith.constant 0 : i32
    %c0_i32_1 = arith.constant 0 : i32
    return %arg0, %c0_i32, %c0_i32_0 : i32, i32, i32
  }
}

</mosaic_0001>

<bundles_post_ra>
// kernel: saint_forward.2
= control target key start
LH: loop header
LB: loop body
LE: loop exit
PB: predicated region body
PF: predicated region fallthrough
CT: control target
= control target key end

     0   :  { %s1294_s25 = smov 0   ;;  %s1419_s0 = inlined_call_operand.vmem [shape: bf16[2,8,32], index: 0, kind: input, shape index: {}]   ;;  %s1420_s1 = inlined_call_operand.vmem [shape: f32[1,32], index: 1, kind: input, shape index: {}]   ;;  %s1421_s2 = inlined_call_operand.vmem [shape: f32[1,32], index: 2, kind: input, shape index: {}]   ;;  %s1422_s3 = inlined_call_operand.vmem [shape: bf16[32,96], index: 3, kind: input, shape index: {}]   ;;  %s1423_s4 = inlined_call_operand.vmem [shape: f32[1,96], index: 4, kind: input, shape index: {}]   ;;  %s1424_s5 = inlined_call_operand.vmem [shape: bf16[32,32], index: 5, kind: input, shape index: {}]   ;;  %s1425_s6 = inlined_call_operand.vmem [shape: f32[1,32], index: 6, kind: input, shape index: {}]   ;;  %s1426_s7 = inlined_call_operand.vmem [shape: f32[1,32], index: 7, kind: input, shape index: {}]   ;;  %s1427_s8 = inlined_call_operand.vmem [shape: f32[1,32], index: 8, kind: input, shape index: {}]   ;;  %s1428_s9 = inlined_call_operand.vmem [shape: bf16[32,32], index: 9, kind: input, shape index: {}]   ;;  %s1429_s10 = inlined_call_operand.vmem [shape: f32[1,32], index: 10, kind: input, shape index: {}]   ;;  %s1430_s11 = inlined_call_operand.vmem [shape: bf16[32,32], index: 11, kind: input, shape index: {}]   ;;  %s1431_s12 = inlined_call_operand.vmem [shape: f32[1,32], index: 12, kind: input, shape index: {}]   ;;  %s1432_s13 = inlined_call_operand.vmem [shape: bf16[2,8,32], index: 13, kind: output, shape index: {}]  }
   0x1 LB: > { %s1063_s26 = sadd.s32 4294967295, %s1214_s25   ;;  %p1067_p0 = scmp.ge.s32.totalorder %s1214_s25, 1  ;;  %s1214_s25 = sphi %s1294_s25, %s23_s25  }
   0x2   : > { %p386_p1 = scmp.lt.s32.totalorder %s1214_s25, 3 }
   0x4   : > { %p387_p2 = pnand %p1067_p0, %p386_p1 }
   0x5   : > { %p428_p3 = scmp.lt.s32.totalorder (!%p387_p2), %s1063_s26, 1  ;;  %vm441_vm0 = vcmask (!%p387_p2), 261120   ;;  %v1188_v8 = vld [vmem:[%s1422_s3] sm:$0xff] (!%p387_p2)   ;;  %v1216_v9 = vmov (!%p387_p2), 0.0   ;;  %v1189_v10 = vld [vmem:[%s1422_s3 + $0x8] sm:$0xff] (!%p387_p2)   ;;  %vm1217_vm1 = vmmov (!%p387_p2), 0   ;;  %v542_v35 = vlaneseq (!%p387_p2) }
   0x6   : > { %390 = sbr.rel (%p387_p2) target bundleno = 2510 (0x9ce), region = 72  ;;  %1116 = vmatprep.subr.bf16.mxu0 (!%p387_p2), %v1216_v9  ;;  %1124 = vmatprep.subr.bf16.mxu1 (!%p387_p2), %v1216_v9  ;;  %v1070_v15 = vld [vmem:[%s1420_s1] ss:$0 sm:$0xff] (!%p387_p2)  ;;  %s1218_s24 = smov (!%p387_p2), 96   ;;  %vm554_vm2 = vcmask (!%p387_p2), 130048   ;;  %vm601_vm4 = vcmask (!%p387_p2), 64512  }
   0x7   : > { %1117 = vmatpush3.bf16.msra.mxu0 (!%p387_p2), %v1188_v8  ;;  %1120 = vmatprep.mubr.msk.bf16.mxu0 (!%p387_p2), %vm1217_vm1, %v1216_v9  ;;  %v1071_v17 = vld [vmem:[%s1421_s2] ss:$0 sm:$0xff] (!%p387_p2)  ;;  %s1219_s28 = smov (!%p387_p2), 112   ;;  %s1220_s29 = smov (!%p387_p2), 80   ;;  %v543_v36 = vshrl.u32 (!%p387_p2), %v542_v35, 7  ;;  %v545_v37 = vand.u32 (!%p387_p2), 127, %v542_v35 }
   0x8   : > { %1118 = vmatprep.subr.bf16.mxu0 (!%p387_p2), %v1216_v9  ;;  %1126 = vmatprep.mubr.msk.bf16.mxu1 (!%p387_p2), %vm1217_vm1, %v1216_v9  ;;  %v1072_v21 = vld [vmem:[%s1423_s4] ss:$0 sm:$0xff] (!%p387_p2)  ;;  %s1222_s14 = smov (!%p387_p2), 64   ;;  %vm619_vm5 = vcmask (!%p387_p2), 1043456   ;;  %s1223_s19 = smov (!%p387_p2), 16   ;;  %vm1008_vm6 = vcmask (!%p387_p2), 257024  }
   0x9   : > { %vm546_vm3 = vcmp.gt.s32.totalorder (!%p387_p2), %v545_v37, %v543_v36  ;;  %v1192_v37 = vld [vmem:[%s1428_s9] sm:$0xff] (!%p387_p2)  }
   0xa   : > { %v547_v38 = vsel (!%p387_p2), %vm546_vm3, -1e+30, %v1216_v9 }
   0xb   : > { %1119 = vmatpush3.bf16.msra.mxu0 (!%p387_p2), %v1189_v10  ;;  %v1190_v10 = vld [vmem:[%s1424_s5] sm:$0xff] (!%p387_p2)  }
   0xc   : > { %1130 = vmatprep.subr.bf16.mxu0 (!%p387_p2), %v1216_v9 }
   0xd   : > { %s1434_s26 = smov (!%p428_p3, %s1063_s26), 1 }
   0xe   : > { %s1068_s27 = sshll.u32 %s1434_s26, 2 }
   0xf   : > { %s431_s30 = scalar_lea.vmem %s1419_s0, %s1068_s27 }
  0x10   : > { %v437_v0 = vld [vmem:[%s431_s30] sm:$0xf]  ;;  %s1221_s30 = smov 48  }
  0x11   : > { %v438_v1 = vunpack.c.l.bf16 %v437_v0 }
  0x13   : > { %v442_v2 = vsel %vm441_vm0, %v438_v1, 0.0 }
  0x14   : > { %443 = vadd.xlane.f32.xlu0 %v442_v2 }
  0xa1   : > { %v444_v3 = vpop.xlane.xlu0 %443 }
  0xa2   : > { %v446_v4 = vmul.f32 0.03125, %v444_v3 }
  0xa4   : > { %v447_v5 = vsub.f32 %v438_v1, %v446_v4 }
  0xa6   : > { %v448_v6 = vmul.f32 %v447_v5, %v447_v5 }
  0xa8   : > { %v449_v7 = vsel %vm441_vm0, %v448_v6, 0.0 }
  0xa9   : > { %450 = vadd.xlane.f32.xlu0 %v449_v7 }
 0x136   : > { %v451_v11 = vpop.xlane.xlu0 %450 }
 0x137   : > { %v452_v12 = vmul.f32 0.03125, %v451_v11  ;;  %v1191_v11 = vld [vmem:[%s1424_s5 + $0x8] sm:$0xff]  }
 0x139   : > { %v453_v13 = vadd.f32 1e-05, %v452_v12 }
 0x13b   : > { %1196 = vrsqrt.f32 %v453_v13 }
 0x145   : > { %v1197_v14 = vpop.eup %1196 }
 0x146   : > { %v455_v16 = vmul.f32 %v1197_v14, %v447_v5 }
 0x148   : > { %v462_v18 = vmul.f32 %v1070_v15, %v455_v16 }
 0x14a   : > { %v1332_v19 = vadd.f32 %v1071_v17, %v462_v18 }
 0x14c   : > { %v480_v20 = vpack.c.bf16 %v1332_v19, %v1332_v19 }
 0x14e   : > { %1121 = vmatmul.mubr.msk.bf16.vlgmr.msra.gmra.mrb[0].mxu0 %vm441_vm0, %v480_v20 }
 0x14f   : > { %1132 = vmatprep.mubr.msk.bf16.mxu0 %vm1217_vm1, %v1216_v9 }
 0x221   : > { %v536_v22 = vpop.f32.mrb[0].mxu0 }
 0x222   : > { %v537_v23 = vadd.f32 %v1072_v21, %v536_v22  ;;  %v1122_v24 = vpop.f32.mrb[1].mxu0 }
 0x223   : > { %v539_v25 = vpop.f32.mrb[2].mxu0  ;;  %v1080_v24 = vld [vmem:[%s1425_s6] ss:$0 sm:$0xff] }
 0x224   : > { %v548_v26 = vmul.f32 0.25, %v537_v23  ;;  %v550_v27 = vpack.c.bf16 %v537_v23, %v537_v23  ;;  %v1123_v28 = vpop.f32.mrb[3].mxu0 }
 0x226   : > { %v549_v29 = vpack.c.bf16 %v548_v26, %v548_v26  ;;  %552 = vrot.lane.b32.xlu1 %v550_v27, %s1218_s24 }
 0x228   : > { %664 = vrot.lane.b32.xlu0 %v549_v29, %s1219_s28 }
 0x22a   : > { %666 = vrot.lane.b32.xlu1 %v550_v27, %s1220_s29  ;;  %s435_s29 = scalar_lea.vmem %s1432_s13, %s1068_s27 }
 0x298   : > { %v553_v30 = vpop.permute.xlu1 %552 }
 0x299   : > { %v559_v31 = vsel %vm554_vm2, %v553_v30, 0 }
 0x29a   : > { %1125 = vmatpush3.bf16.xpose.msra.mxu1 %v559_v31  ;;  %v665_v34 = vpop.permute.xlu0 %664 }
 0x29b   : > { %1136 = vmatprep.subr.bf16.mxu1 %v1216_v9 }
 0x29c   : > { %v667_v32 = vpop.permute.xlu1 %666 }
 0x29d   : > { %v672_v33 = vsel %vm554_vm2, %v667_v32, 0 }
 0x2a1   : > { %1127 = vmatmul.mubr.msk.bf16.vlgmr.msra.gmra.mrb[0].mxu1 %vm554_vm2, %v549_v29 }
 0x2a2   : > { %1137 = vmatpush3.bf16.xpose.msra.mxu1 %v672_v33  ;;  %1138 = vmatprep.mubr.msk.bf16.mxu1 %vm1217_vm1, %v1216_v9 }
 0x2a3   : > { %1148 = vmatprep.subr.bf16.mxu1 %v1216_v9 }
 0x2a9   : > { %1139 = vmatmul.mubr.msk.bf16.vlgmr.msra.gmra.mrb[4].mxu1 %vm554_vm2, %v665_v34 }
 0x2aa   : > { %1152 = vmatprep.mubr.msk.bf16.mxu1 %vm1217_vm1, %v1216_v9  ;;  %1149 = vmatpush3.bf16.msra.mxu1 %v1190_v10 }
 0x2ab   : > { %1150 = vmatprep.subr.bf16.mxu1 %v1216_v9 }
 0x2ae   : > { %1151 = vmatpush3.bf16.msra.mxu1 %v1191_v11 }
 0x2af   : > { %1164 = vmatprep.subr.bf16.mxu1 %v1216_v9 }
 0x374   : > { %v595_v39 = vpop.f32.mrb[0].mxu1 }
 0x375   : > { %v596_v40 = vadd.f32 %v595_v39, %v547_v38  ;;  %v1128_v41 = vpop.f32.mrb[1].mxu1 }
 0x376   : > { %v598_v42 = vpop.f32.mrb[2].mxu1 }
 0x377   : > { %v1129_v43 = vpop.f32.mrb[3].mxu1  ;;  %v602_v44 = vsel %vm601_vm4, %v596_v40, -inf  ;;  %v1084_v42 = vld [vmem:[%s1426_s7] ss:$0 sm:$0xff] }
 0x378   : > { %603 = vmax.xlane.f32.xlu1 %v602_v44  ;;  %v1085_v44 = vld [vmem:[%s1427_s8] ss:$0 sm:$0xff] }
 0x37c   : > { %v708_v45 = vpop.f32.mrb[4].mxu1 }
 0x37d   : > { %v709_v46 = vadd.f32 %v708_v45, %v547_v38  ;;  %v1140_v47 = vpop.f32.mrb[5].mxu1 }
 0x37e   : > { %v711_v48 = vpop.f32.mrb[6].mxu1 }
 0x37f   : > { %v1141_v49 = vpop.f32.mrb[7].mxu1  ;;  %v714_v50 = vsel %vm601_vm4, %v709_v46, -inf  ;;  %v1194_v48 = vld [vmem:[%s1430_s11] sm:$0xff]  }
 0x380   : > { %715 = vmax.xlane.f32.xlu0 %v714_v50  ;;  %v1195_v49 = vld [vmem:[%s1430_s11 + $0x8] sm:$0xff]   ;;  %v1086_v50 = vld [vmem:[%s1429_s10] ss:$0 sm:$0xff] }
 0x396   : > { %726 = vrot.lane.b32.xlu0 %v550_v27, %s1221_s30 }
 0x405   : > { %v604_v51 = vpop.xlane.xlu1 %603 }
 0x406   : > { %v605_v52 = vsub.f32 %v596_v40, %v604_v51 }
 0x408   : > { %v606_v53 = vmul.f32 1.442695, %v605_v52 }
 0x40a   : > { %1198 = vpow2.f32 %v606_v53 }
 0x40d   : > { %v716_v54 = vpop.xlane.xlu0 %715 }
 0x40e   : > { %v717_v55 = vsub.f32 %v709_v46, %v716_v54 }
 0x410   : > { %v718_v56 = vmul.f32 1.442695, %v717_v55 }
 0x411   : > { %v727_v3 = vpop.permute.xlu0 %726 }
 0x412   : > { %1200 = vpow2.f32 %v718_v56  ;;  %v732_v5 = vsel %vm619_vm5, %v727_v3, 0 }
 0x414   : > { %v1199_v57 = vpop.eup %1198 }
 0x415   : > { %v608_v58 = vsel %vm601_vm4, %v1199_v57, 0.0 }
 0x416   : > { %609 = vadd.xlane.f32.xlu1 %v608_v58 }
 0x41c   : > { %v1201_v59 = vpop.eup %1200 }
 0x41d   : > { %v720_v60 = vsel %vm601_vm4, %v1201_v59, 0.0 }
 0x41e   : > { %721 = vadd.xlane.f32.xlu1 %v720_v60 }
 0x42f   : > { %614 = vrot.lane.b32.xlu1 %v550_v27, %s1222_s14 }
 0x4a3   : > { %v610_v61 = vpop.xlane.xlu1 %609 }
 0x4a4   : > { %1202 = vrcp.f32 %v610_v61 }
 0x4ab   : > { %v722_v62 = vpop.xlane.xlu1 %721 }
 0x4ac   : > { %1204 = vrcp.f32 %v722_v62 }
 0x4ae   : > { %v1203_v63 = vpop.eup %1202 }
 0x4af   : > { %v612_v0 = vmul.f32 %v1203_v63, %v1199_v57  ;;  %v615_v1 = vpop.permute.xlu1 %614 }
 0x4b0   : > { %v621_v2 = vsel %vm619_vm5, %v615_v1, 0 }
 0x4b1   : > { %1131 = vmatpush3.bf16.msra.mxu0 %v621_v2  ;;  %v613_v4 = vpack.c.bf16 %v612_v0, %v612_v0 }
 0x4b2   : > { %1142 = vmatprep.subr.bf16.mxu0 %v1216_v9 }
 0x4b4   : > { %1133 = vmatmul.mubr.msk.bf16.vlgmr.msra.gmra.mrb[4].mxu0 %vm601_vm4, %v613_v4 }
 0x4b5   : > { %1143 = vmatpush3.bf16.msra.mxu0 %v732_v5  ;;  %1144 = vmatprep.mubr.msk.bf16.mxu0 %vm1217_vm1, %v1216_v9 }
 0x4b6   : > { %v1205_v6 = vpop.eup %1204  ;;  %1156 = vmatprep.subr.bf16.mxu0 %v1216_v9 }
 0x4b7   : > { %v724_v7 = vmul.f32 %v1205_v6, %v1201_v59 }
 0x4b9   : > { %v725_v8 = vpack.c.bf16 %v724_v7, %v724_v7 }
 0x4bc   : > { %1145 = vmatmul.mubr.msk.bf16.vlgmr.msra.gmra.mrb[8].mxu0 %vm601_vm4, %v725_v8 }
 0x4bd   : > { %1160 = vmatprep.mubr.msk.bf16.mxu0 %vm1217_vm1, %v1216_v9  ;;  %1157 = vmatpush3.bf16.msra.mxu0 %v1192_v37 }
 0x4be   : > { %1158 = vmatprep.subr.bf16.mxu0 %v1216_v9 }
 0x587   : > { %v657_v12 = vpop.f32.mrb[4].mxu0 }
 0x588   : > { %v1134_v13 = vpop.f32.mrb[5].mxu0 }
 0x589   : > { %v660_v14 = vpop.f32.mrb[6].mxu0 }
 0x58a   : > { %v1135_v15 = vpop.f32.mrb[7].mxu0 }
 0x58f   : > { %v768_v16 = vpop.f32.mrb[8].mxu0 }
 0x590   : > { %775 = vrot.lane.b32.xlu1 %v768_v16, %s1223_s19  ;;  %v1146_v17 = vpop.f32.mrb[9].mxu0 }
 0x591   : > { %v771_v18 = vpop.f32.mrb[10].mxu0 }
 0x592   : > { %v1147_v20 = vpop.f32.mrb[11].mxu0 }
 0x602   : > { %v776_v21 = vpop.permute.xlu1 %775 }
 0x603   : > { %v778_v22 = vsel %vm554_vm2, %v657_v12, %v776_v21 }
 0x604   : > { %v779_v23 = vpack.c.bf16 %v778_v22, %v778_v22 }
 0x606   : > { %1153 = vmatmul.mubr.msk.bf16.vlgmr.msra.gmra.mrb[8].mxu1 %vm441_vm0, %v779_v23 }
 0x607   : > { %1168 = vmatprep.mubr.msk.bf16.mxu1 %vm1217_vm1, %v1216_v9  ;;  %1165 = vmatpush3.bf16.msra.mxu1 %v1194_v48 }
 0x608   : > { %1166 = vmatprep.subr.bf16.mxu1 %v1216_v9  ;;  %v1090_v9 = vld [vmem:[%s1431_s12] ss:$0 sm:$0xff] }
 0x60b   : > { %1167 = vmatpush3.bf16.msra.mxu1 %v1195_v49 }
 0x6d9   : > { %v835_v25 = vpop.f32.mrb[8].mxu1 }
 0x6da   : > { %v836_v26 = vadd.f32 %v1080_v24, %v835_v25  ;;  %v1154_v27 = vpop.f32.mrb[9].mxu1 }
 0x6db   : > { %v838_v28 = vpop.f32.mrb[10].mxu1 }
 0x6dc   : > { %v1155_v29 = vpop.f32.mrb[11].mxu1  ;;  %v841_v30 = vadd.f32 %v836_v26, %v1332_v19  ;;  %v1193_v19 = vld [vmem:[%s1428_s9 + $0x8] sm:$0xff]  }
 0x6dd   : > { %1159 = vmatpush3.bf16.msra.mxu0 %v1193_v19 }
 0x6de   : > { %v844_v31 = vsel %vm441_vm0, %v841_v30, 0.0 }
 0x6df   : > { %845 = vadd.xlane.f32.xlu1 %v844_v31 }
 0x76c   : > { %v846_v32 = vpop.xlane.xlu1 %845 }
 0x76d   : > { %v847_v33 = vmul.f32 0.03125, %v846_v32 }
 0x76f   : > { %v848_v34 = vsub.f32 %v841_v30, %v847_v33 }
 0x771   : > { %v849_v35 = vmul.f32 %v848_v34, %v848_v34 }
 0x773   : > { %v850_v36 = vsel %vm441_vm0, %v849_v35, 0.0 }
 0x774   : > { %851 = vadd.xlane.f32.xlu0 %v850_v36 }
 0x801   : > { %v852_v38 = vpop.xlane.xlu0 %851 }
 0x802   : > { %v853_v39 = vmul.f32 0.03125, %v852_v38 }
 0x804   : > { %v854_v40 = vadd.f32 1e-05, %v853_v39 }
 0x806   : > { %1206 = vrsqrt.f32 %v854_v40 }
 0x810   : > { %v1207_v41 = vpop.eup %1206 }
 0x811   : > { %v856_v43 = vmul.f32 %v1207_v41, %v848_v34 }
 0x813   : > { %v863_v45 = vmul.f32 %v1084_v42, %v856_v43 }
 0x815   : > { %v870_v46 = vadd.f32 %v1085_v44, %v863_v45 }
 0x817   : > { %v881_v47 = vpack.c.bf16 %v870_v46, %v870_v46 }
 0x819   : > { %1161 = vmatmul.mubr.msk.bf16.vlgmr.msra.gmra.mrb[12].mxu0 %vm441_vm0, %v881_v47 }
 0x8ec   : > { %v937_v51 = vpop.f32.mrb[12].mxu0 }
 0x8ed   : > { %v938_v52 = vadd.f32 %v1086_v50, %v937_v51  ;;  %v1162_v53 = vpop.f32.mrb[13].mxu0 }
 0x8ee   : > { %v940_v54 = vpop.f32.mrb[14].mxu0 }
 0x8ef   : > { %v943_v55 = vmax.f32 %v938_v52, 0.0  ;;  %v1163_v56 = vpop.f32.mrb[15].mxu0 }
 0x8f1   : > { %v944_v57 = vpack.c.bf16 %v943_v55, %v943_v55 }
 0x8f3   : > { %1169 = vmatmul.mubr.msk.bf16.vlgmr.msra.gmra.mrb[12].mxu1 %vm441_vm0, %v944_v57 }
 0x9c6   : > { %v1000_v58 = vpop.f32.mrb[12].mxu1 }
 0x9c7   : > { %v1001_v59 = vadd.f32 %v1090_v9, %v1000_v58  ;;  %v1170_v60 = vpop.f32.mrb[13].mxu1 }
 0x9c8   : > { %v1003_v61 = vpop.f32.mrb[14].mxu1 }
 0x9c9   : > { %v1006_v62 = vadd.f32 %v1001_v59, %v870_v46  ;;  %v1171_v63 = vpop.f32.mrb[15].mxu1 }
 0x9cb   : > { %v1007_v0 = vpack.c.bf16 %v1006_v62, %v1006_v62 }
 0x9cd   : > { %1009 = vst.msk [vmem:[%s435_s29] sm:$0xf] %vm1008_vm6, %v1007_v0 }
 0x9ce PF: > { %s23_s25 = sadd.s32 1, %s1214_s25  }
 0x9cf   : > { %p20_p4 = scmp.ge.s32.totalorder %s23_s25, 4  }
 0x9d1   :  { %22 = sbr.rel (!%p20_p4) target bundleno = 1 (0x1), region = 102 }

// kernel: saint_forward.3
= control target key start
LH: loop header
LB: loop body
LE: loop exit
PB: predicated region body
PF: predicated region fallthrough
CT: control target
= control target key end

     0   :  { %s2304_s0 = inlined_call_operand.vmem [shape: bf16[2,8,32], index: 0, kind: input, shape index: {}]   ;;  %s2305_s1 = inlined_call_operand.vmem [shape: bf16[2,8,32], index: 1, kind: input, shape index: {}]   ;;  %s2306_s2 = inlined_call_operand.vmem [shape: f32[1,32], index: 2, kind: input, shape index: {}]   ;;  %s2307_s3 = inlined_call_operand.vmem [shape: f32[1,32], index: 3, kind: input, shape index: {}]   ;;  %s2308_s4 = inlined_call_operand.vmem [shape: bf16[32,96], index: 4, kind: input, shape index: {}]   ;;  %s2309_s5 = inlined_call_operand.vmem [shape: f32[1,96], index: 5, kind: input, shape index: {}]   ;;  %s2310_s6 = inlined_call_operand.vmem [shape: bf16[32,32], index: 6, kind: input, shape index: {}]   ;;  %s2311_s7 = inlined_call_operand.vmem [shape: f32[1,32], index: 7, kind: input, shape index: {}]   ;;  %s2312_s8 = inlined_call_operand.vmem [shape: f32[1,32], index: 8, kind: input, shape index: {}]   ;;  %s2313_s9 = inlined_call_operand.vmem [shape: f32[1,32], index: 9, kind: input, shape index: {}]   ;;  %s2314_s10 = inlined_call_operand.vmem [shape: bf16[32,96], index: 10, kind: input, shape index: {}]   ;;  %s2315_s11 = inlined_call_operand.vmem [shape: f32[1,96], index: 11, kind: input, shape index: {}]   ;;  %s2316_s12 = inlined_call_operand.vmem [shape: bf16[32,32], index: 12, kind: input, shape index: {}]   ;;  %s2317_s13 = inlined_call_operand.vmem [shape: f32[1,32], index: 13, kind: input, shape index: {}]   ;;  %s2318_s14 = inlined_call_operand.vmem [shape: f32[1,32], index: 14, kind: input, shape index: {}]   ;;  %s2319_s15 = inlined_call_operand.vmem [shape: f32[1,32], index: 15, kind: input, shape index: {}]   ;;  %s2320_s16 = inlined_call_operand.vmem [shape: bf16[32,32], index: 16, kind: input, shape index: {}]   ;;  %s2321_s17 = inlined_call_operand.vmem [shape: f32[1,32], index: 17, kind: input, shape index: {}]   ;;  %s2322_s18 = inlined_call_operand.vmem [shape: bf16[32,32], index: 18, kind: input, shape index: {}]   ;;  %s2323_s19 = inlined_call_operand.vmem [shape: f32[1,32], index: 19, kind: input, shape index: {}]   ;;  %s2324_s20 = inlined_call_operand.vmem [shape: bf16[2,8,32], index: 20, kind: output, shape index: {}]  }
   0x1   :  { %2326 = sst [smem:[#allocation2_spill]] %s2304_s0 }
   0x2   :  { %2327 = sst [smem:[#allocation3_spill]] %s2305_s1  ;;  %s2087_s1 = smov 0  }
   0x3   :  { %2328 = sst [smem:[#allocation4_spill]] %s2306_s2 }
   0x4   :  { %2329 = sst [smem:[#allocation5_spill]] %s2307_s3 }
   0x5   :  { %2330 = sst [smem:[#allocation6_spill]] %s2308_s4 }
   0x6 LB: > { %s1726_s22 = sadd.s32 4294967295, %s1972_s1   ;;  %p1730_p0 = scmp.ge.s32.totalorder %s1972_s1, 1  ;;  %s1972_s1 = sphi %s2087_s1, %s30_s1  }
   0x7   : > { %p570_p1 = scmp.lt.s32.totalorder %s1972_s1, 3 }
   0x9   : > { %p571_p2 = pnand %p1730_p0, %p570_p1 }
   0xa   : > { %p630_p3 = scmp.lt.s32.totalorder (!%p571_p2), %s1726_s22, 1  ;;  %vm647_vm0 = vcmask (!%p571_p2), 261120   ;;  %s2331_s25 = sld [smem:[#allocation2_spill]] (!%p571_p2)  ;;  %v1974_v9 = vmov (!%p571_p2), 0.0   ;;  %vm1975_vm1 = vmmov (!%p571_p2), 0   ;;  %vm760_vm2 = vcmask (!%p571_p2), 130048  }
   0xb   : > { %574 = sbr.rel (%p571_p2) target bundleno = 3946 (0xf6a), region = 100  ;;  %s2332_s28 = sld [smem:[#allocation6_spill]] (!%p571_p2)  ;;  %1812 = vmatprep.subr.bf16.mxu0 (!%p571_p2), %v1974_v9  ;;  %1820 = vmatprep.subr.bf16.mxu1 (!%p571_p2), %v1974_v9  ;;  %v1736_v21 = vld [vmem:[%s2309_s5] ss:$0 sm:$0xff] (!%p571_p2)  ;;  %v748_v35 = vlaneseq (!%p571_p2)  ;;  %vm807_vm4 = vcmask (!%p571_p2), 64512   ;;  %vm825_vm5 = vcmask (!%p571_p2), 1043456  }
   0xc   : > { %1816 = vmatprep.mubr.msk.bf16.mxu0 (!%p571_p2), %vm1975_vm1, %v1974_v9  ;;  %1822 = vmatprep.mubr.msk.bf16.mxu1 (!%p571_p2), %vm1975_vm1, %v1974_v9  ;;  %s2333_s21 = sld [smem:[#allocation4_spill]] (!%p571_p2)  ;;  %s2334_s2 = sld [smem:[#allocation5_spill]] (!%p571_p2)  ;;  %vm1659_vm6 = vcmask (!%p571_p2), 257024  }
   0xd   : > { %s1976_s26 = smov (!%p571_p2), 96   ;;  %s1977_s27 = smov (!%p571_p2), 112   ;;  %v749_v36 = vshrl.u32 (!%p571_p2), %v748_v35, 7  ;;  %v751_v37 = vand.u32 (!%p571_p2), 127, %v748_v35  ;;  %v1750_v35 = vld [vmem:[%s2315_s11] ss:$0 sm:$0xff] (!%p571_p2) }
   0xe   : > { %s1978_s4 = smov (!%p571_p2), 80   ;;  %s1979_s29 = smov (!%p571_p2), 48  }
   0xf   : > { %vm752_vm3 = vcmp.gt.s32.totalorder (!%p571_p2), %v751_v37, %v749_v36  ;;  %s1980_s30 = smov (!%p571_p2), 64  }
  0x10   : > { %v2147_v38 = vsel (!%p571_p2), %vm752_vm3, -1e+30, %v1974_v9 }
  0x11   : > { %v1932_v8 = vld [vmem:[%s2332_s28] sm:$0xff] (!%p571_p2)   ;;  %v1933_v10 = vld [vmem:[%s2332_s28 + $0x8] sm:$0xff] (!%p571_p2)  }
  0x12   : > { %s2337_s22 = smov (!%p630_p3, %s1726_s22), 1  ;;  %1813 = vmatpush3.bf16.msra.mxu0 %v1932_v8  ;;  %v1734_v15 = vld [vmem:[%s2333_s21] ss:$0 sm:$0xff] }
  0x13   : > { %s2095_s23 = sshll.u32 %s2337_s22, 2  ;;  %1814 = vmatprep.subr.bf16.mxu0 %v1974_v9  ;;  %v1735_v17 = vld [vmem:[%s2334_s2] ss:$0 sm:$0xff]  ;;  %s1981_s2 = smov 16  }
  0x14   : > { %s633_s3 = scalar_lea.vmem %s2331_s25, %s2095_s23 }
  0x15   : > { %v643_v0 = vld [vmem:[%s633_s3] sm:$0xf] }
  0x16   : > { %v644_v1 = vunpack.c.l.bf16 %v643_v0  ;;  %1815 = vmatpush3.bf16.msra.mxu0 %v1933_v10  ;;  %v1934_v10 = vld [vmem:[%s2310_s6] sm:$0xff]  }
  0x17   : > { %1826 = vmatprep.subr.bf16.mxu0 %v1974_v9 }
  0x18   : > { %v648_v2 = vsel %vm647_vm0, %v644_v1, 0.0 }
  0x19   : > { %649 = vadd.xlane.f32.xlu0 %v648_v2 }
  0xa6   : > { %v650_v3 = vpop.xlane.xlu0 %649 }
  0xa7   : > { %v652_v4 = vmul.f32 0.03125, %v650_v3 }
  0xa9   : > { %v653_v5 = vsub.f32 %v644_v1, %v652_v4 }
  0xab   : > { %v654_v6 = vmul.f32 %v653_v5, %v653_v5 }
  0xad   : > { %v655_v7 = vsel %vm647_vm0, %v654_v6, 0.0 }
  0xae   : > { %656 = vadd.xlane.f32.xlu0 %v655_v7 }
 0x13b   : > { %v657_v11 = vpop.xlane.xlu0 %656 }
 0x13c   : > { %v658_v12 = vmul.f32 0.03125, %v657_v11  ;;  %v1935_v11 = vld [vmem:[%s2310_s6 + $0x8] sm:$0xff]  }
 0x13e   : > { %v659_v13 = vadd.f32 1e-05, %v658_v12 }
 0x140   : > { %1944 = vrsqrt.f32 %v659_v13 }
 0x14a   : > { %v1945_v14 = vpop.eup %1944 }
 0x14b   : > { %v661_v16 = vmul.f32 %v1945_v14, %v653_v5 }
 0x14d   : > { %v668_v18 = vmul.f32 %v1734_v15, %v661_v16 }
 0x14f   : > { %v2123_v19 = vadd.f32 %v1735_v17, %v668_v18 }
 0x151   : > { %v686_v20 = vpack.c.bf16 %v2123_v19, %v2123_v19 }
 0x153   : > { %1817 = vmatmul.mubr.msk.bf16.vlgmr.msra.gmra.mrb[0].mxu0 %vm647_vm0, %v686_v20 }
 0x154   : > { %1828 = vmatprep.mubr.msk.bf16.mxu0 %vm1975_vm1, %v1974_v9 }
 0x226   : > { %v742_v22 = vpop.f32.mrb[0].mxu0 }
 0x227   : > { %v743_v23 = vadd.f32 %v1736_v21, %v742_v22  ;;  %v1818_v24 = vpop.f32.mrb[1].mxu0 }
 0x228   : > { %v745_v25 = vpop.f32.mrb[2].mxu0  ;;  %v1936_v24 = vld [vmem:[%s2314_s10] sm:$0xff]  }
 0x229   : > { %v754_v26 = vmul.f32 0.25, %v743_v23  ;;  %v756_v27 = vpack.c.bf16 %v743_v23, %v743_v23  ;;  %v1819_v28 = vpop.f32.mrb[3].mxu0  ;;  %v1937_v25 = vld [vmem:[%s2314_s10 + $0x8] sm:$0xff]  }
 0x22b   : > { %v755_v29 = vpack.c.bf16 %v754_v26, %v754_v26  ;;  %758 = vrot.lane.b32.xlu1 %v756_v27, %s1976_s26 }
 0x22d   : > { %870 = vrot.lane.b32.xlu0 %v755_v29, %s1977_s27 }
 0x22f   : > { %872 = vrot.lane.b32.xlu1 %v756_v27, %s1978_s4 }
 0x29d   : > { %v759_v30 = vpop.permute.xlu1 %758 }
 0x29e   : > { %v765_v31 = vsel %vm760_vm2, %v759_v30, 0 }
 0x29f   : > { %1821 = vmatpush3.bf16.xpose.msra.mxu1 %v765_v31  ;;  %v871_v34 = vpop.permute.xlu0 %870 }
 0x2a0   : > { %1832 = vmatprep.subr.bf16.mxu1 %v1974_v9 }
 0x2a1   : > { %v873_v32 = vpop.permute.xlu1 %872 }
 0x2a2   : > { %v878_v33 = vsel %vm760_vm2, %v873_v32, 0 }
 0x2a6   : > { %1823 = vmatmul.mubr.msk.bf16.vlgmr.msra.gmra.mrb[0].mxu1 %vm760_vm2, %v755_v29 }
 0x2a7   : > { %1833 = vmatpush3.bf16.xpose.msra.mxu1 %v878_v33  ;;  %1834 = vmatprep.mubr.msk.bf16.mxu1 %vm1975_vm1, %v1974_v9 }
 0x2a8   : > { %1844 = vmatprep.subr.bf16.mxu1 %v1974_v9 }
 0x2ae   : > { %1835 = vmatmul.mubr.msk.bf16.vlgmr.msra.gmra.mrb[4].mxu1 %vm760_vm2, %v871_v34 }
 0x2af   : > { %1848 = vmatprep.mubr.msk.bf16.mxu1 %vm1975_vm1, %v1974_v9  ;;  %1845 = vmatpush3.bf16.msra.mxu1 %v1934_v10 }
 0x2b0   : > { %1846 = vmatprep.subr.bf16.mxu1 %v1974_v9 }
 0x2b3   : > { %1847 = vmatpush3.bf16.msra.mxu1 %v1935_v11 }
 0x2b4   : > { %1860 = vmatprep.subr.bf16.mxu1 %v1974_v9 }
 0x379   : > { %v801_v39 = vpop.f32.mrb[0].mxu1 }
 0x37a   : > { %v802_v40 = vadd.f32 %v801_v39, %v2147_v38  ;;  %v1824_v41 = vpop.f32.mrb[1].mxu1  ;;  %v1744_v39 = vld [vmem:[%s2311_s7] ss:$0 sm:$0xff] }
 0x37b   : > { %v804_v42 = vpop.f32.mrb[2].mxu1 }
 0x37c   : > { %v1825_v43 = vpop.f32.mrb[3].mxu1  ;;  %v808_v44 = vsel %vm807_vm4, %v802_v40, -inf }
 0x37d   : > { %809 = vmax.xlane.f32.xlu1 %v808_v44 }
 0x381   : > { %v914_v45 = vpop.f32.mrb[4].mxu1 }
 0x382   : > { %v915_v46 = vadd.f32 %v914_v45, %v2147_v38  ;;  %v1836_v47 = vpop.f32.mrb[5].mxu1 }
 0x383   : > { %v917_v48 = vpop.f32.mrb[6].mxu1 }
 0x384   : > { %v1837_v49 = vpop.f32.mrb[7].mxu1  ;;  %v920_v50 = vsel %vm807_vm4, %v915_v46, -inf }
 0x385   : > { %921 = vmax.xlane.f32.xlu0 %v920_v50  ;;  %v1748_v50 = vld [vmem:[%s2312_s8] ss:$0 sm:$0xff] }
 0x39b   : > { %932 = vrot.lane.b32.xlu0 %v756_v27, %s1979_s29  ;;  %s2335_s29 = sld [smem:[#allocation3_spill]] }
 0x40a   : > { %v810_v51 = vpop.xlane.xlu1 %809 }
 0x40b   : > { %v811_v52 = vsub.f32 %v802_v40, %v810_v51 }
 0x40d   : > { %v812_v53 = vmul.f32 1.442695, %v811_v52 }
 0x40f   : > { %1946 = vpow2.f32 %v812_v53 }
 0x412   : > { %v922_v54 = vpop.xlane.xlu0 %921 }
 0x413   : > { %v923_v55 = vsub.f32 %v915_v46, %v922_v54 }
 0x415   : > { %v924_v56 = vmul.f32 1.442695, %v923_v55 }
 0x416   : > { %v933_v3 = vpop.permute.xlu0 %932 }
 0x417   : > { %1948 = vpow2.f32 %v924_v56  ;;  %v938_v5 = vsel %vm825_vm5, %v933_v3, 0 }
 0x419   : > { %v1947_v57 = vpop.eup %1946 }
 0x41a   : > { %v814_v58 = vsel %vm807_vm4, %v1947_v57, 0.0 }
 0x41b   : > { %815 = vadd.xlane.f32.xlu1 %v814_v58 }
 0x421   : > { %v1949_v59 = vpop.eup %1948 }
 0x422   : > { %v926_v60 = vsel %vm807_vm4, %v1949_v59, 0.0 }
 0x423   : > { %927 = vadd.xlane.f32.xlu1 %v926_v60 }
 0x434   : > { %820 = vrot.lane.b32.xlu1 %v756_v27, %s1980_s30  ;;  %s637_s30 = scalar_lea.vmem %s2335_s29, %s2095_s23 }
 0x435   : > { %v1048_v21 = vld [vmem:[%s637_s30] sm:$0xf] }
 0x436   : > { %v1049_v22 = vunpack.c.l.bf16 %v1048_v21 }
 0x438   : > { %v1052_v23 = vsel %vm647_vm0, %v1049_v22, 0.0 }
 0x4a8   : > { %v816_v61 = vpop.xlane.xlu1 %815 }
 0x4a9   : > { %1950 = vrcp.f32 %v816_v61 }
 0x4b0   : > { %v928_v62 = vpop.xlane.xlu1 %927 }
 0x4b1   : > { %1952 = vrcp.f32 %v928_v62 }
 0x4b3   : > { %v1951_v63 = vpop.eup %1950 }
 0x4b4   : > { %v818_v0 = vmul.f32 %v1951_v63, %v1947_v57  ;;  %v821_v1 = vpop.permute.xlu1 %820 }
 0x4b5   : > { %v827_v2 = vsel %vm825_vm5, %v821_v1, 0 }
 0x4b6   : > { %1827 = vmatpush3.bf16.msra.mxu0 %v827_v2  ;;  %v819_v4 = vpack.c.bf16 %v818_v0, %v818_v0 }
 0x4b7   : > { %1838 = vmatprep.subr.bf16.mxu0 %v1974_v9 }
 0x4b9   : > { %1829 = vmatmul.mubr.msk.bf16.vlgmr.msra.gmra.mrb[4].mxu0 %vm807_vm4, %v819_v4 }
 0x4ba   : > { %1839 = vmatpush3.bf16.msra.mxu0 %v938_v5  ;;  %1840 = vmatprep.mubr.msk.bf16.mxu0 %vm1975_vm1, %v1974_v9 }
 0x4bb   : > { %v1953_v6 = vpop.eup %1952  ;;  %1852 = vmatprep.subr.bf16.mxu0 %v1974_v9 }
 0x4bc   : > { %v930_v7 = vmul.f32 %v1953_v6, %v1949_v59 }
 0x4be   : > { %v931_v8 = vpack.c.bf16 %v930_v7, %v930_v7 }
 0x4c1   : > { %1841 = vmatmul.mubr.msk.bf16.vlgmr.msra.gmra.mrb[8].mxu0 %vm807_vm4, %v931_v8 }
 0x4c2   : > { %1856 = vmatprep.mubr.msk.bf16.mxu0 %vm1975_vm1, %v1974_v9  ;;  %1853 = vmatpush3.bf16.msra.mxu0 %v1936_v24 }
 0x4c3   : > { %1854 = vmatprep.subr.bf16.mxu0 %v1974_v9 }
 0x4c6   : > { %1855 = vmatpush3.bf16.msra.mxu0 %v1937_v25 }
 0x4c7   : > { %1868 = vmatprep.subr.bf16.mxu0 %v1974_v9 }
 0x58c   : > { %v863_v12 = vpop.f32.mrb[4].mxu0 }
 0x58d   : > { %v1830_v13 = vpop.f32.mrb[5].mxu0 }
 0x58e   : > { %v866_v14 = vpop.f32.mrb[6].mxu0 }
 0x58f   : > { %v1831_v15 = vpop.f32.mrb[7].mxu0 }
 0x594   : > { %v974_v16 = vpop.f32.mrb[8].mxu0 }
 0x595   : > { %981 = vrot.lane.b32.xlu1 %v974_v16, %s1981_s2  ;;  %v1842_v17 = vpop.f32.mrb[9].mxu0 }
 0x596   : > { %v977_v18 = vpop.f32.mrb[10].mxu0 }
 0x597   : > { %v1843_v20 = vpop.f32.mrb[11].mxu0 }
 0x5b9   : > { %1053 = vadd.xlane.f32.xlu1 %v1052_v23 }
 0x5ca   : > { %1152 = vrot.lane.b32.xlu1 %v1936_v24, %s1976_s26 }
 0x5ce   : > { %1158 = vrot.lane.b32.xlu1 %v1750_v35, %s1976_s26 }
 0x607   : > { %v982_v26 = vpop.permute.xlu1 %981 }
 0x608   : > { %v984_v27 = vsel %vm760_vm2, %v863_v12, %v982_v26 }
 0x609   : > { %v985_v28 = vpack.c.bf16 %v984_v27, %v984_v27 }
 0x60b   : > { %1849 = vmatmul.mubr.msk.bf16.vlgmr.msra.gmra.mrb[8].mxu1 %vm647_vm0, %v985_v28 }
 0x60c   : > { %1864 = vmatprep.mubr.msk.bf16.mxu1 %vm1975_vm1, %v1974_v9 }
 0x646   : > { %v1054_v29 = vpop.xlane.xlu1 %1053 }
 0x647   : > { %v1055_v30 = vmul.f32 0.03125, %v1054_v29 }
 0x649   : > { %v1056_v31 = vsub.f32 %v1049_v22, %v1055_v30 }
 0x64a   : > { %v1153_v34 = vpop.permute.xlu1 %1152 }
 0x64b   : > { %v1057_v32 = vmul.f32 %v1056_v31, %v1056_v31  ;;  %1861 = vmatpush3.bf16.msra.mxu1 %v1153_v34 }
 0x64c   : > { %1862 = vmatprep.subr.bf16.mxu1 %v1974_v9 }
 0x64d   : > { %v1058_v33 = vsel %vm647_vm0, %v1057_v32, 0.0 }
 0x64e   : > { %1059 = vadd.xlane.f32.xlu0 %v1058_v33  ;;  %v1159_v59 = vpop.permute.xlu1 %1158 }
 0x664   : > { %1154 = vrot.lane.b32.xlu0 %v1937_v25, %s1976_s26 }
 0x6db   : > { %v1060_v36 = vpop.xlane.xlu0 %1059 }
 0x6dc   : > { %v1061_v37 = vmul.f32 0.03125, %v1060_v36 }
 0x6de   : > { %v1062_v40 = vadd.f32 1e-05, %v1061_v37  ;;  %v1041_v41 = vpop.f32.mrb[8].mxu1 }
 0x6df   : > { %v1042_v42 = vadd.f32 %v1744_v39, %v1041_v41  ;;  %v1850_v43 = vpop.f32.mrb[9].mxu1  ;;  %v1155_v44 = vpop.permute.xlu0 %1154 }
 0x6e0   : > { %1954 = vrsqrt.f32 %v1062_v40  ;;  %v1044_v45 = vpop.f32.mrb[10].mxu1  ;;  %1863 = vmatpush3.bf16.msra.mxu1 %v1155_v44 }
 0x6e1   : > { %v2203_v46 = vadd.f32 %v1042_v42, %v2123_v19  ;;  %v1851_v47 = vpop.f32.mrb[11].mxu1  ;;  %1874 = vmatprep.subr.bf16.mxu1 %v1974_v9  ;;  %v1749_v19 = vld [vmem:[%s2313_s9] ss:$0 sm:$0xff] }
 0x6e2   : > { %v1938_v45 = vld [vmem:[%s2316_s12] sm:$0xff]  }
 0x6e3   : > { %v1089_v48 = vpack.c.bf16 %v2203_v46, %v2203_v46 }
 0x6e5   : > { %1857 = vmatmul.mubr.msk.bf16.vlgmr.msra.gmra.mrb[12].mxu0 %vm647_vm0, %v1089_v48 }
 0x6e6   : > { %1870 = vmatprep.mubr.msk.bf16.mxu0 %vm1975_vm1, %v1974_v9 }
 0x6ea   : > { %v1955_v49 = vpop.eup %1954 }
 0x6eb   : > { %v1064_v51 = vmul.f32 %v1955_v49, %v1056_v31 }
 0x6ed   : > { %v1071_v52 = vmul.f32 %v1748_v50, %v1064_v51  ;;  %v1939_v51 = vld [vmem:[%s2316_s12 + $0x8] sm:$0xff]  }
 0x6ef   : > { %v1078_v53 = vadd.f32 %v1749_v19, %v1071_v52 }
 0x6f1   : > { %v1151_v54 = vpack.c.bf16 %v1078_v53, %v1078_v53 }
 0x6f3   : > { %1865 = vmatmul.mubr.msk.bf16.vlgmr.msra.gmra.mrb[12].mxu1 %vm647_vm0, %v1151_v54 }
 0x6f4   : > { %1876 = vmatprep.mubr.msk.bf16.mxu1 %vm1975_vm1, %v1974_v9 }
 0x7b8   : > { %v1145_v55 = vpop.f32.mrb[12].mxu0 }
 0x7b9   : > { %v1858_v56 = vpop.f32.mrb[13].mxu0  ;;  %v1146_v60 = vadd.f32 %v1750_v35, %v1145_v55 }
 0x7ba   : > { %v1148_v57 = vpop.f32.mrb[14].mxu0 }
 0x7bb   : > { %v1859_v58 = vpop.f32.mrb[15].mxu0  ;;  %v1204_v1 = vmul.f32 0.25, %v1146_v60 }
 0x7bc   : > { %v1759_v58 = vld [vmem:[%s2317_s13] ss:$0 sm:$0xff] }
 0x7bd   : > { %v1205_v5 = vpack.c.bf16 %v1204_v1, %v1204_v1 }
 0x7c6   : > { %v1198_v61 = vpop.f32.mrb[12].mxu1 }
 0x7c7   : > { %v1199_v62 = vadd.f32 %v1198_v61, %v1159_v59  ;;  %v1866_v63 = vpop.f32.mrb[13].mxu1 }
 0x7c8   : > { %v1201_v0 = vpop.f32.mrb[14].mxu1 }
 0x7c9   : > { %v1206_v2 = vpack.c.bf16 %v1199_v62, %v1199_v62  ;;  %v1867_v3 = vpop.f32.mrb[15].mxu1 }
 0x7cb   : > { %1317 = vrot.lane.b32.xlu1 %v1206_v2, %s1977_s27  ;;  %v1211_v4 = vsel %vm760_vm2, %v1206_v2, 0 }
 0x7cc   : > { %1869 = vmatpush3.bf16.xpose.msra.mxu0 %v1211_v4 }
 0x7cd   : > { %1880 = vmatprep.subr.bf16.mxu0 %v1974_v9 }
 0x7cf   : > { %1315 = vrot.lane.b32.xlu1 %v1205_v5, %s1977_s27 }
 0x7d3   : > { %1871 = vmatmul.mubr.msk.bf16.vlgmr.msra.gmra.mrb[16].mxu0 %vm760_vm2, %v1205_v5 }
 0x7d4   : > { %1882 = vmatprep.mubr.msk.bf16.mxu0 %vm1975_vm1, %v1974_v9 }
 0x83d   : > { %v1318_v6 = vpop.permute.xlu1 %1317 }
 0x83e   : > { %v1323_v7 = vsel %vm760_vm2, %v1318_v6, 0 }
 0x83f   : > { %1881 = vmatpush3.bf16.xpose.msra.mxu0 %v1323_v7  ;;  %v1940_v7 = vld [vmem:[%s2320_s16] sm:$0xff]  }
 0x840   : > { %1892 = vmatprep.subr.bf16.mxu0 %v1974_v9 }
 0x841   : > { %v1316_v8 = vpop.permute.xlu1 %1315 }
 0x846   : > { %1883 = vmatmul.mubr.msk.bf16.vlgmr.msra.gmra.mrb[20].mxu0 %vm760_vm2, %v1316_v8 }
 0x847   : > { %1896 = vmatprep.mubr.msk.bf16.mxu0 %vm1975_vm1, %v1974_v9  ;;  %1893 = vmatpush3.bf16.msra.mxu0 %v1938_v45 }
 0x848   : > { %1894 = vmatprep.subr.bf16.mxu0 %v1974_v9 }
 0x84b   : > { %1895 = vmatpush3.bf16.msra.mxu0 %v1939_v51 }
 0x84c   : > { %1908 = vmatprep.subr.bf16.mxu0 %v1974_v9 }
 0x8a6   : > { %v1247_v10 = vpop.f32.mrb[16].mxu0 }
 0x8a7   : > { %v1248_v11 = vadd.f32 %v1247_v10, %v2147_v38  ;;  %v1872_v12 = vpop.f32.mrb[17].mxu0 }
 0x8a8   : > { %v1250_v13 = vpop.f32.mrb[18].mxu0 }
 0x8a9   : > { %v1873_v14 = vpop.f32.mrb[19].mxu0  ;;  %v1253_v15 = vsel %vm807_vm4, %v1248_v11, -inf  ;;  %v1763_v13 = vld [vmem:[%s2318_s14] ss:$0 sm:$0xff] }
 0x8aa   : > { %1254 = vmax.xlane.f32.xlu0 %v1253_v15  ;;  %v1764_v15 = vld [vmem:[%s2319_s15] ss:$0 sm:$0xff] }
 0x919   : > { %v1359_v16 = vpop.f32.mrb[20].mxu0 }
 0x91a   : > { %v1360_v17 = vadd.f32 %v1359_v16, %v2147_v38  ;;  %v1884_v18 = vpop.f32.mrb[21].mxu0 }
 0x91b   : > { %v1362_v20 = vpop.f32.mrb[22].mxu0 }
 0x91c   : > { %v1885_v21 = vpop.f32.mrb[23].mxu0  ;;  %v1365_v22 = vsel %vm807_vm4, %v1360_v17, -inf  ;;  %v1942_v20 = vld [vmem:[%s2322_s18] sm:$0xff]  }
 0x91d   : > { %1366 = vmax.xlane.f32.xlu1 %v1365_v22  ;;  %v1943_v21 = vld [vmem:[%s2322_s18 + $0x8] sm:$0xff]   ;;  %v1765_v22 = vld [vmem:[%s2321_s17] ss:$0 sm:$0xff] }
 0x92e   : > { %1266 = vrot.lane.b32.xlu1 %v1206_v2, %s1976_s26  ;;  %s641_s26 = scalar_lea.vmem %s2324_s20, %s2095_s23 }
 0x937   : > { %v1255_v23 = vpop.xlane.xlu0 %1254 }
 0x938   : > { %v1256_v24 = vsub.f32 %v1248_v11, %v1255_v23 }
 0x93a   : > { %v1257_v25 = vmul.f32 1.442695, %v1256_v24 }
 0x93c   : > { %1956 = vpow2.f32 %v1257_v25 }
 0x946   : > { %v1957_v26 = vpop.eup %1956 }
 0x947   : > { %v1259_v27 = vsel %vm807_vm4, %v1957_v26, 0.0 }
 0x948   : > { %1260 = vadd.xlane.f32.xlu0 %v1259_v27 }
 0x9aa   : > { %v1367_v28 = vpop.xlane.xlu1 %1366 }
 0x9ab   : > { %v1368_v29 = vsub.f32 %v1360_v17, %v1367_v28 }
 0x9ad   : > { %v1369_v30 = vmul.f32 1.442695, %v1368_v29 }
 0x9ae   : > { %v1267_v38 = vpop.permute.xlu1 %1266 }
 0x9af   : > { %1958 = vpow2.f32 %v1369_v30  ;;  %v1272_v31 = vsel %vm825_vm5, %v1267_v38, 0 }
 0x9b0   : > { %1875 = vmatpush3.bf16.msra.mxu1 %v1272_v31 }
 0x9b1   : > { %1886 = vmatprep.subr.bf16.mxu1 %v1974_v9 }
 0x9b9   : > { %v1959_v32 = vpop.eup %1958 }
 0x9ba   : > { %v1371_v33 = vsel %vm807_vm4, %v1959_v32, 0.0 }
 0x9bb   : > { %1372 = vadd.xlane.f32.xlu0 %v1371_v33 }
 0x9d1   : > { %1377 = vrot.lane.b32.xlu0 %v1206_v2, %s1978_s4 }
 0x9d5   : > { %v1261_v34 = vpop.xlane.xlu0 %1260 }
 0x9d6   : > { %1960 = vrcp.f32 %v1261_v34 }
 0x9e0   : > { %v1961_v35 = vpop.eup %1960 }
 0x9e1   : > { %v1263_v36 = vmul.f32 %v1961_v35, %v1957_v26 }
 0x9e3   : > { %v1264_v37 = vpack.c.bf16 %v1263_v36, %v1263_v36 }
 0x9e5   : > { %1877 = vmatmul.mubr.msk.bf16.vlgmr.msra.gmra.mrb[16].mxu1 %vm807_vm4, %v1264_v37 }
 0x9e6   : > { %1888 = vmatprep.mubr.msk.bf16.mxu1 %vm1975_vm1, %v1974_v9 }
 0xa48   : > { %v1373_v39 = vpop.xlane.xlu0 %1372 }
 0xa49   : > { %1962 = vrcp.f32 %v1373_v39 }
 0xa4c   : > { %v1378_v40 = vpop.permute.xlu0 %1377 }
 0xa4d   : > { %v1383_v41 = vsel %vm825_vm5, %v1378_v40, 0 }
 0xa4e   : > { %1887 = vmatpush3.bf16.msra.mxu1 %v1383_v41 }
 0xa4f   : > { %1900 = vmatprep.subr.bf16.mxu1 %v1974_v9 }
 0xa53   : > { %v1963_v42 = vpop.eup %1962 }
 0xa54   : > { %v1375_v43 = vmul.f32 %v1963_v42, %v1959_v32 }
 0xa56   : > { %v1376_v44 = vpack.c.bf16 %v1375_v43, %v1375_v43 }
 0xa58   : > { %1889 = vmatmul.mubr.msk.bf16.vlgmr.msra.gmra.mrb[20].mxu1 %vm807_vm4, %v1376_v44 }
 0xa59   : > { %1904 = vmatprep.mubr.msk.bf16.mxu1 %vm1975_vm1, %v1974_v9  ;;  %1901 = vmatpush3.bf16.msra.mxu1 %v1940_v7 }
 0xa5a   : > { %1902 = vmatprep.subr.bf16.mxu1 %v1974_v9 }
 0xab8   : > { %v1308_v47 = vpop.f32.mrb[16].mxu1 }
 0xab9   : > { %v1878_v48 = vpop.f32.mrb[17].mxu1 }
 0xaba   : > { %v1311_v49 = vpop.f32.mrb[18].mxu1 }
 0xabb   : > { %v1879_v50 = vpop.f32.mrb[19].mxu1 }
 0xb2b   : > { %v1419_v19 = vpop.f32.mrb[20].mxu1 }
 0xb2c   : > { %1426 = vrot.lane.b32.xlu1 %v1419_v19, %s1981_s2  ;;  %v1890_v52 = vpop.f32.mrb[21].mxu1 }
 0xb2d   : > { %v1422_v53 = vpop.f32.mrb[22].mxu1 }
 0xb2e   : > { %v1891_v54 = vpop.f32.mrb[23].mxu1 }
 0xb9e   : > { %v1427_v55 = vpop.permute.xlu1 %1426 }
 0xb9f   : > { %v1429_v56 = vsel %vm760_vm2, %v1308_v47, %v1427_v55 }
 0xba0   : > { %v1430_v57 = vpack.c.bf16 %v1429_v56, %v1429_v56 }
 0xba2   : > { %1897 = vmatmul.mubr.msk.bf16.vlgmr.msra.gmra.mrb[24].mxu0 %vm647_vm0, %v1430_v57 }
 0xba3   : > { %1912 = vmatprep.mubr.msk.bf16.mxu0 %vm1975_vm1, %v1974_v9  ;;  %1909 = vmatpush3.bf16.msra.mxu0 %v1942_v20 }
 0xba4   : > { %1910 = vmatprep.subr.bf16.mxu0 %v1974_v9  ;;  %v1769_v9 = vld [vmem:[%s2323_s19] ss:$0 sm:$0xff] }
 0xba7   : > { %1911 = vmatpush3.bf16.msra.mxu0 %v1943_v21 }
 0xc75   : > { %v1486_v59 = vpop.f32.mrb[24].mxu0 }
 0xc76   : > { %v1487_v60 = vadd.f32 %v1759_v58, %v1486_v59  ;;  %v1898_v61 = vpop.f32.mrb[25].mxu0 }
 0xc77   : > { %v1489_v62 = vpop.f32.mrb[26].mxu0 }
 0xc78   : > { %v1899_v63 = vpop.f32.mrb[27].mxu0  ;;  %v1492_v0 = vadd.f32 %v1487_v60, %v2203_v46  ;;  %v1941_v46 = vld [vmem:[%s2320_s16 + $0x8] sm:$0xff]  }
 0xc79   : > { %1903 = vmatpush3.bf16.msra.mxu1 %v1941_v46 }
 0xc7a   : > { %v1495_v1 = vsel %vm647_vm0, %v1492_v0, 0.0 }
 0xc7b   : > { %1496 = vadd.xlane.f32.xlu1 %v1495_v1 }
 0xd08   : > { %v1497_v2 = vpop.xlane.xlu1 %1496 }
 0xd09   : > { %v1498_v3 = vmul.f32 0.03125, %v1497_v2 }
 0xd0b   : > { %v1499_v4 = vsub.f32 %v1492_v0, %v1498_v3 }
 0xd0d   : > { %v1500_v5 = vmul.f32 %v1499_v4, %v1499_v4 }
 0xd0f   : > { %v1501_v6 = vsel %vm647_vm0, %v1500_v5, 0.0 }
 0xd10   : > { %1502 = vadd.xlane.f32.xlu0 %v1501_v6 }
 0xd9d   : > { %v1503_v8 = vpop.xlane.xlu0 %1502 }
 0xd9e   : > { %v1504_v10 = vmul.f32 0.03125, %v1503_v8 }
 0xda0   : > { %v1505_v11 = vadd.f32 1e-05, %v1504_v10 }
 0xda2   : > { %1964 = vrsqrt.f32 %v1505_v11 }
 0xdac   : > { %v1965_v12 = vpop.eup %1964 }
 0xdad   : > { %v1507_v14 = vmul.f32 %v1965_v12, %v1499_v4 }
 0xdaf   : > { %v1514_v16 = vmul.f32 %v1763_v13, %v1507_v14 }
 0xdb1   : > { %v1521_v17 = vadd.f32 %v1764_v15, %v1514_v16 }
 0xdb3   : > { %v1532_v18 = vpack.c.bf16 %v1521_v17, %v1521_v17 }
 0xdb5   : > { %1905 = vmatmul.mubr.msk.bf16.vlgmr.msra.gmra.mrb[24].mxu1 %vm647_vm0, %v1532_v18 }
 0xe88   : > { %v1588_v23 = vpop.f32.mrb[24].mxu1 }
 0xe89   : > { %v1589_v24 = vadd.f32 %v1765_v22, %v1588_v23  ;;  %v1906_v25 = vpop.f32.mrb[25].mxu1 }
 0xe8a   : > { %v1591_v26 = vpop.f32.mrb[26].mxu1 }
 0xe8b   : > { %v1594_v27 = vmax.f32 %v1589_v24, 0.0  ;;  %v1907_v28 = vpop.f32.mrb[27].mxu1 }
 0xe8d   : > { %v1595_v29 = vpack.c.bf16 %v1594_v27, %v1594_v27 }
 0xe8f   : > { %1913 = vmatmul.mubr.msk.bf16.vlgmr.msra.gmra.mrb[28].mxu0 %vm647_vm0, %v1595_v29 }
 0xf62   : > { %v1651_v30 = vpop.f32.mrb[28].mxu0 }
 0xf63   : > { %v1652_v38 = vadd.f32 %v1769_v9, %v1651_v30  ;;  %v1914_v31 = vpop.f32.mrb[29].mxu0 }
 0xf64   : > { %v1654_v32 = vpop.f32.mrb[30].mxu0 }
 0xf65   : > { %v1657_v33 = vadd.f32 %v1652_v38, %v1521_v17  ;;  %v1915_v34 = vpop.f32.mrb[31].mxu0 }
 0xf67   : > { %v1658_v35 = vpack.c.bf16 %v1657_v33, %v1657_v33 }
 0xf69   : > { %1660 = vst.msk [vmem:[%s641_s26] sm:$0xf] %vm1659_vm6, %v1658_v35 }
 0xf6a PF: > { %s30_s1 = sadd.s32 1, %s1972_s1  }
 0xf6b   : > { %p27_p4 = scmp.ge.s32.totalorder %s30_s1, 4  }
 0xf6d   :  { %29 = sbr.rel (!%p27_p4) target bundleno = 6 (0x6), region = 133 }

</bundles_post_ra>
